<compile_context>
chip_gen: v7x
topology: tpu7x:2x2x1
jax: 0.10.0
libtpu: 0.0.40
codegen_flags: <defaults>
</compile_context>

<pallas_src>
import functools
import math

import numpy as np

import jax
import jax.numpy as jnp
from jax import lax
from jax.experimental import pallas as pl
from jax.experimental.pallas import tpu as pltpu


# ----------------------------------------------------------------------------
# Fused forward kernel (one grid step = B_blk whole batch elements)
# ----------------------------------------------------------------------------

def _fused_forward_kernel(*refs, B_blk, L0, ks, pool, lf, n_fc):
    """Whole Voice1DCNN forward for B_blk batch elements, all VMEM-resident.

    refs layout (all full-array / per-batch-block VMEM blocks):
      refs[0]                      : x rows (B_blk*L0, Cin0), channels-last
      refs[1 : 1+2*n_conv]         : per conv layer (w_fused (K*Cin, Cout) bf16
                                                     with BN scale folded in,
                                                     shift   (1, Cout) f32)
      refs[1+2*n_conv : -1]        : per fc layer (w (F, H) bf16, b (1, H) f32)
      refs[-1]                     : out block (1, B_blk, out_dim)
    """
    n_conv = len(ks)
    x_ref = refs[0]
    conv_refs = refs[1:1 + 2 * n_conv]
    fc_refs = refs[1 + 2 * n_conv:1 + 2 * n_conv + 2 * n_fc]
    o_ref = refs[-1]

    flat = x_ref[...].astype(jnp.float32)          # (B_blk*L, Cin), row = b*L + l
    L = L0

    # ---- conv stack: Conv1d('same') + BN(eval) + ReLU + MaxPool, per layer ----
    for i in range(n_conv):
        w_ref = conv_refs[2 * i]                   # (K*Cin, Cout), bf16, BN-scaled
        sh_ref = conv_refs[2 * i + 1]              # (1, Cout), f32
        K = ks[i]
        pad = K // 2
        BL = B_blk * L
        Cout = w_ref.shape[1]

        # Length-position index of every row (block-local); one iota per layer.
        r_idx = lax.broadcasted_iota(jnp.int32, (BL, 1), 0)
        l_idx = r_idx if B_blk == 1 else r_idx - (r_idx // L) * L

        # im2col via masked circular rolls: piece[r] == flat[r + s] where the
        # source stays inside the same batch element, else 0 ('same' padding and
        # interior batch boundaries handled by the single modular-index mask).
        cols = []
        for t in range(K):
            s = t - pad                            # tap shift relative to center
            if s == 0:
                piece = flat
            else:
                piece = pltpu.roll(flat, (-s) % BL, axis=0)   # XLU, no relayout copy
                invalid = (l_idx >= L - s) if s > 0 else (l_idx < -s)
                piece = jnp.where(invalid, 0.0, piece)
            cols.append(piece)
        xcol = jnp.concatenate(cols, axis=1) if K > 1 else cols[0]   # (BL, K*Cin)

        # One MXU matmul per layer; bf16 operands, f32 accumulation.
        y = jnp.dot(xcol.astype(w_ref.dtype), w_ref[...],
                    preferred_element_type=jnp.float32)               # (BL, Cout)
        y = y + sh_ref[...]                        # conv bias + BN (eval), folded
        y = jnp.maximum(y, 0.0)                    # ReLU

        # MaxPool1d(pool): adjacent length rows grouped (batch boundaries stay
        # aligned because L % pool == 0).
        Lo = L // pool
        y = jnp.max(y.reshape(B_blk * Lo, pool, Cout), axis=1)
        # Dropout(0.2) is identity at inference.

        flat = y
        L = Lo

    # ---- flatten (torch NCL -> view(B, -1), i.e. channel-major) --------------
    # Rows are flattened l-major/c-minor with lf slices + one lane concat; the
    # first FC weight is row-permuted on the host so this matches torch exactly.
    if B_blk == 1:
        pieces = [flat[l:l + 1, :] for l in range(lf)]
    else:
        pieces = [flat[l::lf, :] for l in range(lf)]
    h = jnp.concatenate(pieces, axis=1) if lf > 1 else pieces[0]   # (B_blk, lf*C)

    # ---- FC stack: Linear (+ ReLU for hidden layers; Dropout = identity) ------
    for j in range(n_fc):
        w_ref = fc_refs[2 * j]
        b_ref = fc_refs[2 * j + 1]
        h = jnp.dot(h.astype(w_ref.dtype), w_ref[...],
                    preferred_element_type=jnp.float32) + b_ref[...]
        if j < n_fc - 1:
            h = jnp.maximum(h, 0.0)

    o_ref[0] = h.astype(o_ref.dtype)


def voice_1d_cnn_forward(params, x_ncl):
    """x_ncl: (B, Cin, L) float32, PyTorch NCL layout. Single fused pallas_call."""
    meta = params["meta"]
    B, Cin0, L0 = x_ncl.shape
    assert L0 == meta["input_length"], (L0, meta["input_length"])
    assert L0 % 8 == 0, "input_length must be a sublane multiple for this layout"
    pool = meta["pool_size"]
    ks = meta["kernel_sizes"]
    lf = meta["feature_length"]
    out_dim = meta["out_dim"]
    n_fc = len(params["fc"])

    # Batch block: aim for >=256 matmul rows per grid step (v6e/v7x MXU); if the
    # batch can't reach that, fall back to one batch element per step so v7x's
    # two TensorCores both get work via the parallel grid axis.
    B_blk = next((d for d in range(1, B + 1) if B % d == 0 and d * L0 >= 256), 1)
    nblk = B // B_blk

    # NCL -> channels-last flat rows (B*L, Cin); when Cin == 1 the transpose is
    # a logical no-op, so skip it (avoids an extra XLA relayout op).
    if Cin0 == 1:
        x_flat = x_ncl.reshape(B * L0, 1).astype(jnp.float32)
    else:
        x_flat = jnp.transpose(x_ncl, (0, 2, 1)).reshape(B * L0, Cin0).astype(jnp.float32)

    inputs = [x_flat]
    in_specs = [pl.BlockSpec((B_blk * L0, Cin0), lambda i: (i, 0))]
    for (w, sh) in params["conv"]:
        inputs.extend([w, sh])
        in_specs.extend([pl.BlockSpec(w.shape, lambda i: (0, 0)),
                         pl.BlockSpec(sh.shape, lambda i: (0, 0))])
    for (w, b) in params["fc"]:
        inputs.extend([w, b])
        in_specs.extend([pl.BlockSpec(w.shape, lambda i: (0, 0)),
                         pl.BlockSpec(b.shape, lambda i: (0, 0))])

    kernel = functools.partial(
        _fused_forward_kernel,
        B_blk=B_blk, L0=L0, ks=tuple(ks), pool=pool, lf=lf, n_fc=n_fc)

    out = pl.pallas_call(
        kernel,
        grid=(nblk,),
        in_specs=in_specs,
        out_specs=pl.BlockSpec((1, B_blk, out_dim), lambda i: (i, 0, 0)),
        out_shape=jax.ShapeDtypeStruct((nblk, B_blk, out_dim), jnp.float32),
        compiler_params=pltpu.CompilerParams(
            dimension_semantics=("parallel",)),
    )(*inputs)
    return out.reshape(B, out_dim)


# ----------------------------------------------------------------------------
# Parameter construction (deterministic, mirrors Voice1DCNN.__init__)
# ----------------------------------------------------------------------------

def init_params(key, cfg):
    input_length = cfg["input_length"]
    num_conv_layers = cfg["num_conv_layers"]
    conv_channels = cfg["conv_channels"]
    kernel_size = cfg["kernel_size"]
    pool_size = cfg["pool_size"]
    fc_layers = list(cfg["fc_layers"])
    num_classes = cfg["num_classes"]
    task_type = cfg["task_type"]
    eps = 1e-5

    # conv stack configuration (same channel-doubling logic as the torch module)
    conv_cfg = []
    in_channels = 1
    current_channels = conv_channels
    for i in range(num_conv_layers):
        k = kernel_size if i < 2 else max(3, kernel_size // 2)
        conv_cfg.append((in_channels, current_channels, k))
        in_channels = current_channels
        if i % 2 == 1 and i != num_conv_layers - 1:
            current_channels = min(current_channels * 2, 256)

    # Restrictions of this fused kernel (see module-level TODOs).
    for (_, _, k) in conv_cfg:
        assert k % 2 == 1, "even kernel sizes not supported by this kernel"
    assert input_length % (pool_size ** num_conv_layers) == 0, \
        "input_length must be divisible by pool_size**num_conv_layers"

    feature_length = max(1, input_length // pool_size ** num_conv_layers)
    flattened = current_channels * feature_length

    fc_cfg = []
    prev = flattened
    for s in fc_layers:
        fc_cfg.append((prev, s))
        prev = s
    out_dim = num_classes if task_type == "classification" else 1
    fc_cfg.append((prev, out_dim))

    keys = jax.random.split(key, len(conv_cfg) + len(fc_cfg))
    params = {"conv": [], "fc": [], "torch": {"conv": [], "fc": []}}

    for idx, (cin, cout, k) in enumerate(conv_cfg):
        # kaiming_normal_(mode='fan_out', nonlinearity='relu')
        fan_out = cout * k
        std = math.sqrt(2.0 / fan_out)
        w_torch = std * jax.random.normal(keys[idx], (cout, cin, k), jnp.float32)
        b = jnp.zeros((cout,), jnp.float32)
        # BatchNorm1d eval: gamma=1, beta=0, running mean=0, var=1
        gamma = jnp.ones((cout,), jnp.float32)
        beta = jnp.zeros((cout,), jnp.float32)
        rmean = jnp.zeros((cout,), jnp.float32)
        rvar = jnp.ones((cout,), jnp.float32)
        scale = gamma / jnp.sqrt(rvar + eps)
        shift = beta + (b - rmean) * scale           # conv bias folded into BN shift
        # im2col weight: row index = t*Cin + ci (matches kernel's column order);
        # BN scale folded into the weight columns; bf16 for the MXU path.
        w_flat = jnp.transpose(w_torch, (2, 1, 0)).reshape(k * cin, cout)
        w_fused = (w_flat * scale.reshape(1, cout)).astype(jnp.bfloat16)
        params["conv"].append((w_fused, shift.reshape(1, cout)))
        params["torch"]["conv"].append(
            (np.asarray(w_torch), np.asarray(b), np.asarray(gamma), np.asarray(beta),
             np.asarray(rmean), np.asarray(rvar), int(k)))

    for jdx, (fin, fout) in enumerate(fc_cfg):
        kk = keys[len(conv_cfg) + jdx]
        std = math.sqrt(2.0 / (fin + fout))          # xavier_normal_
        w_torch = std * jax.random.normal(kk, (fout, fin), jnp.float32)
        b = jnp.zeros((fout,), jnp.float32)
        w_io = jnp.transpose(w_torch)                # (fin, fout), torch feature order c*Lf+l
        if jdx == 0:
            # Permute rows so the kernel's l-major/c-minor flatten is equivalent
            # to torch's channel-major view(B, -1): V[l*C + c] = W^T[c*Lf + l].
            C, Lf = current_channels, feature_length
            w_io = w_io.reshape(C, Lf, fout).transpose(1, 0, 2).reshape(C * Lf, fout)
        params["fc"].append((w_io.astype(jnp.bfloat16), b.reshape(1, fout)))
        params["torch"]["fc"].append((np.asarray(w_torch), np.asarray(b)))

    params["meta"] = dict(
        input_length=input_length,
        pool_size=pool_size,
        kernel_sizes=tuple(k for (_, _, k) in conv_cfg),
        feature_length=feature_length,
        final_channels=current_channels,
        out_dim=out_dim,
    )
    return params


# ----------------------------------------------------------------------------
# Pure-numpy reference (mirrors the PyTorch forward, eval mode) for validation
# ----------------------------------------------------------------------------

def _reference_forward_numpy(torch_params, x_ncl, pool):
    x = np.asarray(x_ncl, np.float32)                # (B, 1, L), NCL
    eps = 1e-5
    for (w, b, gamma, beta, mean, var, K) in torch_params["conv"]:
        B, Cin, L = x.shape
        Cout = w.shape[0]
        pad = K // 2
        xp = np.pad(x, ((0, 0), (0, 0), (pad, pad)))
        y = np.zeros((B, Cout, L), np.float32)
        for t in range(K):
            y += np.einsum('bcl,dc->bdl', xp[:, :, t:t + L], w[:, :, t])
        y += b.reshape(1, Cout, 1)
        y = ((y - mean.reshape(1, -1, 1)) / np.sqrt(var.reshape(1, -1, 1) + eps)
             * gamma.reshape(1, -1, 1) + beta.reshape(1, -1, 1))
        y = np.maximum(y, 0.0)
        Lo = L // pool
        y = y[:, :, :Lo * pool].reshape(B, Cout, Lo, pool).max(axis=3)
        x = y
    B = x.shape[0]
    h = x.reshape(B, -1)                              # torch: channel-major flatten
    fc = torch_params["fc"]
    for j, (w, b) in enumerate(fc):
        h = h @ w.T + b
        if j < len(fc) - 1:
            h = np.maximum(h, 0.0)
    return h


# ----------------------------------------------------------------------------
# Demo / smoke test
# ----------------------------------------------------------------------------

if __name__ == "__main__":
    cfg = dict(
        task_type="classification",
        input_length=64,          # small, divisible by pool_size**num_conv_layers
        num_classes=2,
        num_conv_layers=4,
        conv_channels=8,
        kernel_size=7,
        pool_size=2,
        fc_layers=(32, 16),
    )
    key = jax.random.PRNGKey(0)
    pkey, xkey = jax.random.split(key)
    params = init_params(pkey, cfg)

    B = 2
    x = jax.random.normal(xkey, (B, 1, cfg["input_length"]), jnp.float32)  # NCL

    out = voice_1d_cnn_forward(params, x)
    out = jax.block_until_ready(out)

    assert out.shape == (B, cfg["num_classes"]), out.shape
    assert bool(jnp.all(jnp.isfinite(out)))

    # Validate against a pure-numpy f32 eval-mode reference of the PyTorch
    # forward.  The kernel uses bf16 MXU operands (deliberate tradeoff), so the
    # tolerance is slightly looser than the f32-only version's 2%.
    ref = _reference_forward_numpy(params["torch"], np.asarray(x), cfg["pool_size"])
    err = float(np.max(np.abs(np.asarray(out) - ref)))
    scale = float(np.max(np.abs(ref)))
    assert err <= 0.03 * scale + 1e-3, (err, scale)

    print("KERNEL_OK")
</pallas_src>

<mosaic_0001>
module attributes {stable_mosaic.version = 11 : i64} {
  func.func @_fused_forward_kernel(%arg0: i32, %arg1: memref<64x1xf32, #tpu.memory_space<vmem>>, %arg2: memref<7x8xbf16, #tpu.memory_space<vmem>>, %arg3: memref<1x8xf32, #tpu.memory_space<vmem>>, %arg4: memref<56x8xbf16, #tpu.memory_space<vmem>>, %arg5: memref<1x8xf32, #tpu.memory_space<vmem>>, %arg6: memref<24x16xbf16, #tpu.memory_space<vmem>>, %arg7: memref<1x16xf32, #tpu.memory_space<vmem>>, %arg8: memref<48x16xbf16, #tpu.memory_space<vmem>>, %arg9: memref<1x16xf32, #tpu.memory_space<vmem>>, %arg10: memref<64x32xbf16, #tpu.memory_space<vmem>>, %arg11: memref<1x32xf32, #tpu.memory_space<vmem>>, %arg12: memref<32x16xbf16, #tpu.memory_space<vmem>>, %arg13: memref<1x16xf32, #tpu.memory_space<vmem>>, %arg14: memref<16x2xbf16, #tpu.memory_space<vmem>>, %arg15: memref<1x2xf32, #tpu.memory_space<vmem>>, %arg16: memref<1x1x2xf32, #tpu.memory_space<vmem>>) attributes {dimension_semantics = [#tpu.dimension_semantics<parallel>], iteration_bounds = array<i64: 2>, scalar_prefetch = 0 : i64, scratch_operands = 0 : i64, tpu.core_type = #tpu.core_type<tc>, window_params = [{transform_indices = @transform_0, window_bounds = array<i64: 64, 1>}, {pipeline_mode = #tpu.pipeline_mode<synchronous>, transform_indices = @transform_1, window_bounds = array<i64: 7, 8>}, {pipeline_mode = #tpu.pipeline_mode<synchronous>, transform_indices = @transform_2, window_bounds = array<i64: 1, 8>}, {pipeline_mode = #tpu.pipeline_mode<synchronous>, transform_indices = @transform_3, window_bounds = array<i64: 56, 8>}, {pipeline_mode = #tpu.pipeline_mode<synchronous>, transform_indices = @transform_4, window_bounds = array<i64: 1, 8>}, {pipeline_mode = #tpu.pipeline_mode<synchronous>, transform_indices = @transform_5, window_bounds = array<i64: 24, 16>}, {pipeline_mode = #tpu.pipeline_mode<synchronous>, transform_indices = @transform_6, window_bounds = array<i64: 1, 16>}, {pipeline_mode = #tpu.pipeline_mode<synchronous>, transform_indices = @transform_7, window_bounds = array<i64: 48, 16>}, {pipeline_mode = #tpu.pipeline_mode<synchronous>, transform_indices = @transform_8, window_bounds = array<i64: 1, 16>}, {pipeline_mode = #tpu.pipeline_mode<synchronous>, transform_indices = @transform_9, window_bounds = array<i64: 64, 32>}, {pipeline_mode = #tpu.pipeline_mode<synchronous>, transform_indices = @transform_10, window_bounds = array<i64: 1, 32>}, {pipeline_mode = #tpu.pipeline_mode<synchronous>, transform_indices = @transform_11, window_bounds = array<i64: 32, 16>}, {pipeline_mode = #tpu.pipeline_mode<synchronous>, transform_indices = @transform_12, window_bounds = array<i64: 1, 16>}, {pipeline_mode = #tpu.pipeline_mode<synchronous>, transform_indices = @transform_13, window_bounds = array<i64: 16, 2>}, {pipeline_mode = #tpu.pipeline_mode<synchronous>, transform_indices = @transform_14, window_bounds = array<i64: 1, 2>}, {transform_indices = @transform_15, window_bounds = array<i64: 1, 1, 2>}]} {
    %c0 = arith.constant 0 : index
    %c0_0 = arith.constant 0 : index
    %0 = vector.load %arg1[%c0, %c0_0] : memref<64x1xf32, #tpu.memory_space<vmem>>, vector<64x1xf32>
    %1 = tpu.iota {dimensions = array<i32: 0>} : vector<64x1xi32>
    %c3_i32 = arith.constant 3 : i32
    %2 = tpu.dynamic_rotate %0 by %c3_i32 dim 0 : vector<64x1xf32>, i32 -> vector<64x1xf32>
    %c3_i32_1 = arith.constant 3 : i32
    %3 = vector.broadcast %c3_i32_1 : i32 to vector<64x1xi32>
    %4 = arith.cmpi slt, %1, %3 : vector<64x1xi32>
    %cst = arith.constant 0.000000e+00 : f32
    %5 = vector.broadcast %cst : f32 to vector<64x1xf32>
    %6 = arith.select %4, %5, %2 : vector<64x1xi1>, vector<64x1xf32>
    %c2_i32 = arith.constant 2 : i32
    %7 = tpu.dynamic_rotate %0 by %c2_i32 dim 0 : vector<64x1xf32>, i32 -> vector<64x1xf32>
    %c2_i32_2 = arith.constant 2 : i32
    %8 = vector.broadcast %c2_i32_2 : i32 to vector<64x1xi32>
    %9 = arith.cmpi slt, %1, %8 : vector<64x1xi32>
    %cst_3 = arith.constant 0.000000e+00 : f32
    %10 = vector.broadcast %cst_3 : f32 to vector<64x1xf32>
    %11 = arith.select %9, %10, %7 : vector<64x1xi1>, vector<64x1xf32>
    %c1_i32 = arith.constant 1 : i32
    %12 = tpu.dynamic_rotate %0 by %c1_i32 dim 0 : vector<64x1xf32>, i32 -> vector<64x1xf32>
    %c1_i32_4 = arith.constant 1 : i32
    %13 = vector.broadcast %c1_i32_4 : i32 to vector<64x1xi32>
    %14 = arith.cmpi slt, %1, %13 : vector<64x1xi32>
    %cst_5 = arith.constant 0.000000e+00 : f32
    %15 = vector.broadcast %cst_5 : f32 to vector<64x1xf32>
    %16 = arith.select %14, %15, %12 : vector<64x1xi1>, vector<64x1xf32>
    %c63_i32 = arith.constant 63 : i32
    %17 = tpu.dynamic_rotate %0 by %c63_i32 dim 0 : vector<64x1xf32>, i32 -> vector<64x1xf32>
    %c63_i32_6 = arith.constant 63 : i32
    %18 = vector.broadcast %c63_i32_6 : i32 to vector<64x1xi32>
    %19 = arith.cmpi sge, %1, %18 : vector<64x1xi32>
    %cst_7 = arith.constant 0.000000e+00 : f32
    %20 = vector.broadcast %cst_7 : f32 to vector<64x1xf32>
    %21 = arith.select %19, %20, %17 : vector<64x1xi1>, vector<64x1xf32>
    %c62_i32 = arith.constant 62 : i32
    %22 = tpu.dynamic_rotate %0 by %c62_i32 dim 0 : vector<64x1xf32>, i32 -> vector<64x1xf32>
    %c62_i32_8 = arith.constant 62 : i32
    %23 = vector.broadcast %c62_i32_8 : i32 to vector<64x1xi32>
    %24 = arith.cmpi sge, %1, %23 : vector<64x1xi32>
    %cst_9 = arith.constant 0.000000e+00 : f32
    %25 = vector.broadcast %cst_9 : f32 to vector<64x1xf32>
    %26 = arith.select %24, %25, %22 : vector<64x1xi1>, vector<64x1xf32>
    %c61_i32 = arith.constant 61 : i32
    %27 = tpu.dynamic_rotate %0 by %c61_i32 dim 0 : vector<64x1xf32>, i32 -> vector<64x1xf32>
    %c61_i32_10 = arith.constant 61 : i32
    %28 = vector.broadcast %c61_i32_10 : i32 to vector<64x1xi32>
    %29 = arith.cmpi sge, %1, %28 : vector<64x1xi32>
    %cst_11 = arith.constant 0.000000e+00 : f32
    %30 = vector.broadcast %cst_11 : f32 to vector<64x1xf32>
    %31 = arith.select %29, %30, %27 : vector<64x1xi1>, vector<64x1xf32>
    %32 = tpu.concatenate %6, %11, %16, %0, %21, %26, %31 in 1 : vector<64x1xf32>, vector<64x1xf32>, vector<64x1xf32>, vector<64x1xf32>, vector<64x1xf32>, vector<64x1xf32>, vector<64x1xf32> -> vector<64x7xf32>
    %33 = arith.truncf %32 : vector<64x7xf32> to vector<64x7xbf16>
    %c0_12 = arith.constant 0 : index
    %c0_13 = arith.constant 0 : index
    %34 = vector.load %arg2[%c0_12, %c0_13] : memref<7x8xbf16, #tpu.memory_space<vmem>>, vector<7x8xbf16>
    %cst_14 = arith.constant dense<0.000000e+00> : vector<64x8xf32>
    %35 = tpu.matmul %33, %34, %cst_14 {dimension_numbers = #tpu.dot_dimension_numbers<[1], [0], [0], [1], [0, 0, 1, 1], [], []>} : vector<64x7xbf16>, vector<7x8xbf16>, vector<64x8xf32> -> vector<64x8xf32>
    %c0_15 = arith.constant 0 : index
    %c0_16 = arith.constant 0 : index
    %36 = vector.load %arg3[%c0_15, %c0_16] : memref<1x8xf32, #tpu.memory_space<vmem>>, vector<1x8xf32>
    %37 = vector.broadcast %36 : vector<1x8xf32> to vector<64x8xf32>
    %38 = arith.addf %35, %37 : vector<64x8xf32>
    %cst_17 = arith.constant 0.000000e+00 : f32
    %39 = vector.broadcast %cst_17 : f32 to vector<64x8xf32>
    %40 = arith.maximumf %38, %39 : vector<64x8xf32>
    %41 = vector.shape_cast %40 : vector<64x8xf32> to vector<32x2x8xf32>
    %cst_18 = arith.constant dense<0xFF800000> : vector<32x8xf32>
    %42 = vector.multi_reduction <maximumf>, %41, %cst_18 [1] : vector<32x2x8xf32> to vector<32x8xf32>
    %43 = tpu.iota {dimensions = array<i32: 0>} : vector<32x1xi32>
    %c3_i32_19 = arith.constant 3 : i32
    %44 = tpu.dynamic_rotate %42 by %c3_i32_19 dim 0 : vector<32x8xf32>, i32 -> vector<32x8xf32>
    %c3_i32_20 = arith.constant 3 : i32
    %45 = vector.broadcast %c3_i32_20 : i32 to vector<32x1xi32>
    %46 = arith.cmpi slt, %43, %45 : vector<32x1xi32>
    %cst_21 = arith.constant 0.000000e+00 : f32
    %47 = vector.shape_cast %46 : vector<32x1xi1> to vector<32x1xi1>
    %48 = vector.broadcast %47 : vector<32x1xi1> to vector<32x8xi1>
    %49 = vector.broadcast %cst_21 : f32 to vector<32x8xf32>
    %50 = arith.select %48, %49, %44 : vector<32x8xi1>, vector<32x8xf32>
    %c2_i32_22 = arith.constant 2 : i32
    %51 = tpu.dynamic_rotate %42 by %c2_i32_22 dim 0 : vector<32x8xf32>, i32 -> vector<32x8xf32>
    %c2_i32_23 = arith.constant 2 : i32
    %52 = vector.broadcast %c2_i32_23 : i32 to vector<32x1xi32>
    %53 = arith.cmpi slt, %43, %52 : vector<32x1xi32>
    %cst_24 = arith.constant 0.000000e+00 : f32
    %54 = vector.shape_cast %53 : vector<32x1xi1> to vector<32x1xi1>
    %55 = vector.broadcast %54 : vector<32x1xi1> to vector<32x8xi1>
    %56 = vector.broadcast %cst_24 : f32 to vector<32x8xf32>
    %57 = arith.select %55, %56, %51 : vector<32x8xi1>, vector<32x8xf32>
    %c1_i32_25 = arith.constant 1 : i32
    %58 = tpu.dynamic_rotate %42 by %c1_i32_25 dim 0 : vector<32x8xf32>, i32 -> vector<32x8xf32>
    %c1_i32_26 = arith.constant 1 : i32
    %59 = vector.broadcast %c1_i32_26 : i32 to vector<32x1xi32>
    %60 = arith.cmpi slt, %43, %59 : vector<32x1xi32>
    %cst_27 = arith.constant 0.000000e+00 : f32
    %61 = vector.shape_cast %60 : vector<32x1xi1> to vector<32x1xi1>
    %62 = vector.broadcast %61 : vector<32x1xi1> to vector<32x8xi1>
    %63 = vector.broadcast %cst_27 : f32 to vector<32x8xf32>
    %64 = arith.select %62, %63, %58 : vector<32x8xi1>, vector<32x8xf32>
    %c31_i32 = arith.constant 31 : i32
    %65 = tpu.dynamic_rotate %42 by %c31_i32 dim 0 : vector<32x8xf32>, i32 -> vector<32x8xf32>
    %c31_i32_28 = arith.constant 31 : i32
    %66 = vector.broadcast %c31_i32_28 : i32 to vector<32x1xi32>
    %67 = arith.cmpi sge, %43, %66 : vector<32x1xi32>
    %cst_29 = arith.constant 0.000000e+00 : f32
    %68 = vector.shape_cast %67 : vector<32x1xi1> to vector<32x1xi1>
    %69 = vector.broadcast %68 : vector<32x1xi1> to vector<32x8xi1>
    %70 = vector.broadcast %cst_29 : f32 to vector<32x8xf32>
    %71 = arith.select %69, %70, %65 : vector<32x8xi1>, vector<32x8xf32>
    %c30_i32 = arith.constant 30 : i32
    %72 = tpu.dynamic_rotate %42 by %c30_i32 dim 0 : vector<32x8xf32>, i32 -> vector<32x8xf32>
    %c30_i32_30 = arith.constant 30 : i32
    %73 = vector.broadcast %c30_i32_30 : i32 to vector<32x1xi32>
    %74 = arith.cmpi sge, %43, %73 : vector<32x1xi32>
    %cst_31 = arith.constant 0.000000e+00 : f32
    %75 = vector.shape_cast %74 : vector<32x1xi1> to vector<32x1xi1>
    %76 = vector.broadcast %75 : vector<32x1xi1> to vector<32x8xi1>
    %77 = vector.broadcast %cst_31 : f32 to vector<32x8xf32>
    %78 = arith.select %76, %77, %72 : vector<32x8xi1>, vector<32x8xf32>
    %c29_i32 = arith.constant 29 : i32
    %79 = tpu.dynamic_rotate %42 by %c29_i32 dim 0 : vector<32x8xf32>, i32 -> vector<32x8xf32>
    %c29_i32_32 = arith.constant 29 : i32
    %80 = vector.broadcast %c29_i32_32 : i32 to vector<32x1xi32>
    %81 = arith.cmpi sge, %43, %80 : vector<32x1xi32>
    %cst_33 = arith.constant 0.000000e+00 : f32
    %82 = vector.shape_cast %81 : vector<32x1xi1> to vector<32x1xi1>
    %83 = vector.broadcast %82 : vector<32x1xi1> to vector<32x8xi1>
    %84 = vector.broadcast %cst_33 : f32 to vector<32x8xf32>
    %85 = arith.select %83, %84, %79 : vector<32x8xi1>, vector<32x8xf32>
    %86 = tpu.concatenate %50, %57, %64, %42, %71, %78, %85 in 1 : vector<32x8xf32>, vector<32x8xf32>, vector<32x8xf32>, vector<32x8xf32>, vector<32x8xf32>, vector<32x8xf32>, vector<32x8xf32> -> vector<32x56xf32>
    %87 = arith.truncf %86 : vector<32x56xf32> to vector<32x56xbf16>
    %c0_34 = arith.constant 0 : index
    %c0_35 = arith.constant 0 : index
    %88 = vector.load %arg4[%c0_34, %c0_35] : memref<56x8xbf16, #tpu.memory_space<vmem>>, vector<56x8xbf16>
    %cst_36 = arith.constant dense<0.000000e+00> : vector<32x8xf32>
    %89 = tpu.matmul %87, %88, %cst_36 {dimension_numbers = #tpu.dot_dimension_numbers<[1], [0], [0], [1], [0, 0, 1, 1], [], []>} : vector<32x56xbf16>, vector<56x8xbf16>, vector<32x8xf32> -> vector<32x8xf32>
    %c0_37 = arith.constant 0 : index
    %c0_38 = arith.constant 0 : index
    %90 = vector.load %arg5[%c0_37, %c0_38] : memref<1x8xf32, #tpu.memory_space<vmem>>, vector<1x8xf32>
    %91 = vector.broadcast %90 : vector<1x8xf32> to vector<32x8xf32>
    %92 = arith.addf %89, %91 : vector<32x8xf32>
    %cst_39 = arith.constant 0.000000e+00 : f32
    %93 = vector.broadcast %cst_39 : f32 to vector<32x8xf32>
    %94 = arith.maximumf %92, %93 : vector<32x8xf32>
    %95 = vector.shape_cast %94 : vector<32x8xf32> to vector<16x2x8xf32>
    %cst_40 = arith.constant dense<0xFF800000> : vector<16x8xf32>
    %96 = vector.multi_reduction <maximumf>, %95, %cst_40 [1] : vector<16x2x8xf32> to vector<16x8xf32>
    %97 = tpu.iota {dimensions = array<i32: 0>} : vector<16x1xi32>
    %c1_i32_41 = arith.constant 1 : i32
    %98 = tpu.dynamic_rotate %96 by %c1_i32_41 dim 0 : vector<16x8xf32>, i32 -> vector<16x8xf32>
    %c1_i32_42 = arith.constant 1 : i32
    %99 = vector.broadcast %c1_i32_42 : i32 to vector<16x1xi32>
    %100 = arith.cmpi slt, %97, %99 : vector<16x1xi32>
    %cst_43 = arith.constant 0.000000e+00 : f32
    %101 = vector.shape_cast %100 : vector<16x1xi1> to vector<16x1xi1>
    %102 = vector.broadcast %101 : vector<16x1xi1> to vector<16x8xi1>
    %103 = vector.broadcast %cst_43 : f32 to vector<16x8xf32>
    %104 = arith.select %102, %103, %98 : vector<16x8xi1>, vector<16x8xf32>
    %c15_i32 = arith.constant 15 : i32
    %105 = tpu.dynamic_rotate %96 by %c15_i32 dim 0 : vector<16x8xf32>, i32 -> vector<16x8xf32>
    %c15_i32_44 = arith.constant 15 : i32
    %106 = vector.broadcast %c15_i32_44 : i32 to vector<16x1xi32>
    %107 = arith.cmpi sge, %97, %106 : vector<16x1xi32>
    %cst_45 = arith.constant 0.000000e+00 : f32
    %108 = vector.shape_cast %107 : vector<16x1xi1> to vector<16x1xi1>
    %109 = vector.broadcast %108 : vector<16x1xi1> to vector<16x8xi1>
    %110 = vector.broadcast %cst_45 : f32 to vector<16x8xf32>
    %111 = arith.select %109, %110, %105 : vector<16x8xi1>, vector<16x8xf32>
    %112 = tpu.concatenate %104, %96, %111 in 1 : vector<16x8xf32>, vector<16x8xf32>, vector<16x8xf32> -> vector<16x24xf32>
    %113 = arith.truncf %112 : vector<16x24xf32> to vector<16x24xbf16>
    %c0_46 = arith.constant 0 : index
    %c0_47 = arith.constant 0 : index
    %114 = vector.load %arg6[%c0_46, %c0_47] : memref<24x16xbf16, #tpu.memory_space<vmem>>, vector<24x16xbf16>
    %cst_48 = arith.constant dense<0.000000e+00> : vector<16x16xf32>
    %115 = tpu.matmul %113, %114, %cst_48 {dimension_numbers = #tpu.dot_dimension_numbers<[1], [0], [0], [1], [0, 0, 1, 1], [], []>} : vector<16x24xbf16>, vector<24x16xbf16>, vector<16x16xf32> -> vector<16x16xf32>
    %c0_49 = arith.constant 0 : index
    %c0_50 = arith.constant 0 : index
    %116 = vector.load %arg7[%c0_49, %c0_50] : memref<1x16xf32, #tpu.memory_space<vmem>>, vector<1x16xf32>
    %117 = vector.broadcast %116 : vector<1x16xf32> to vector<16x16xf32>
    %118 = arith.addf %115, %117 : vector<16x16xf32>
    %cst_51 = arith.constant 0.000000e+00 : f32
    %119 = vector.broadcast %cst_51 : f32 to vector<16x16xf32>
    %120 = arith.maximumf %118, %119 : vector<16x16xf32>
    %121 = vector.shape_cast %120 : vector<16x16xf32> to vector<8x2x16xf32>
    %cst_52 = arith.constant dense<0xFF800000> : vector<8x16xf32>
    %122 = vector.multi_reduction <maximumf>, %121, %cst_52 [1] : vector<8x2x16xf32> to vector<8x16xf32>
    %123 = tpu.iota {dimensions = array<i32: 0>} : vector<8x1xi32>
    %c1_i32_53 = arith.constant 1 : i32
    %124 = tpu.dynamic_rotate %122 by %c1_i32_53 dim 0 : vector<8x16xf32>, i32 -> vector<8x16xf32>
    %c1_i32_54 = arith.constant 1 : i32
    %125 = vector.broadcast %c1_i32_54 : i32 to vector<8x1xi32>
    %126 = arith.cmpi slt, %123, %125 : vector<8x1xi32>
    %cst_55 = arith.constant 0.000000e+00 : f32
    %127 = vector.shape_cast %126 : vector<8x1xi1> to vector<8x1xi1>
    %128 = vector.broadcast %127 : vector<8x1xi1> to vector<8x16xi1>
    %129 = vector.broadcast %cst_55 : f32 to vector<8x16xf32>
    %130 = arith.select %128, %129, %124 : vector<8x16xi1>, vector<8x16xf32>
    %c7_i32 = arith.constant 7 : i32
    %131 = tpu.dynamic_rotate %122 by %c7_i32 dim 0 : vector<8x16xf32>, i32 -> vector<8x16xf32>
    %c7_i32_56 = arith.constant 7 : i32
    %132 = vector.broadcast %c7_i32_56 : i32 to vector<8x1xi32>
    %133 = arith.cmpi sge, %123, %132 : vector<8x1xi32>
    %cst_57 = arith.constant 0.000000e+00 : f32
    %134 = vector.shape_cast %133 : vector<8x1xi1> to vector<8x1xi1>
    %135 = vector.broadcast %134 : vector<8x1xi1> to vector<8x16xi1>
    %136 = vector.broadcast %cst_57 : f32 to vector<8x16xf32>
    %137 = arith.select %135, %136, %131 : vector<8x16xi1>, vector<8x16xf32>
    %138 = tpu.concatenate %130, %122, %137 in 1 : vector<8x16xf32>, vector<8x16xf32>, vector<8x16xf32> -> vector<8x48xf32>
    %139 = arith.truncf %138 : vector<8x48xf32> to vector<8x48xbf16>
    %c0_58 = arith.constant 0 : index
    %c0_59 = arith.constant 0 : index
    %140 = vector.load %arg8[%c0_58, %c0_59] : memref<48x16xbf16, #tpu.memory_space<vmem>>, vector<48x16xbf16>
    %cst_60 = arith.constant dense<0.000000e+00> : vector<8x16xf32>
    %141 = tpu.matmul %139, %140, %cst_60 {dimension_numbers = #tpu.dot_dimension_numbers<[1], [0], [0], [1], [0, 0, 1, 1], [], []>} : vector<8x48xbf16>, vector<48x16xbf16>, vector<8x16xf32> -> vector<8x16xf32>
    %c0_61 = arith.constant 0 : index
    %c0_62 = arith.constant 0 : index
    %142 = vector.load %arg9[%c0_61, %c0_62] : memref<1x16xf32, #tpu.memory_space<vmem>>, vector<1x16xf32>
    %143 = vector.broadcast %142 : vector<1x16xf32> to vector<8x16xf32>
    %144 = arith.addf %141, %143 : vector<8x16xf32>
    %cst_63 = arith.constant 0.000000e+00 : f32
    %145 = vector.broadcast %cst_63 : f32 to vector<8x16xf32>
    %146 = arith.maximumf %144, %145 : vector<8x16xf32>
    %147 = vector.shape_cast %146 : vector<8x16xf32> to vector<4x2x16xf32>
    %cst_64 = arith.constant dense<0xFF800000> : vector<4x16xf32>
    %148 = vector.multi_reduction <maximumf>, %147, %cst_64 [1] : vector<4x2x16xf32> to vector<4x16xf32>
    %149 = vector.extract_strided_slice %148 {offsets = [0, 0], sizes = [1, 16], strides = [1, 1]} : vector<4x16xf32> to vector<1x16xf32>
    %150 = vector.extract_strided_slice %148 {offsets = [1, 0], sizes = [1, 16], strides = [1, 1]} : vector<4x16xf32> to vector<1x16xf32>
    %151 = vector.extract_strided_slice %148 {offsets = [2, 0], sizes = [1, 16], strides = [1, 1]} : vector<4x16xf32> to vector<1x16xf32>
    %152 = vector.extract_strided_slice %148 {offsets = [3, 0], sizes = [1, 16], strides = [1, 1]} : vector<4x16xf32> to vector<1x16xf32>
    %153 = tpu.concatenate %149, %150, %151, %152 in 1 : vector<1x16xf32>, vector<1x16xf32>, vector<1x16xf32>, vector<1x16xf32> -> vector<1x64xf32>
    %154 = arith.truncf %153 : vector<1x64xf32> to vector<1x64xbf16>
    %c0_65 = arith.constant 0 : index
    %c0_66 = arith.constant 0 : index
    %155 = vector.load %arg10[%c0_65, %c0_66] : memref<64x32xbf16, #tpu.memory_space<vmem>>, vector<64x32xbf16>
    %cst_67 = arith.constant dense<0.000000e+00> : vector<1x32xf32>
    %156 = tpu.matmul %154, %155, %cst_67 {dimension_numbers = #tpu.dot_dimension_numbers<[1], [0], [0], [1], [0, 0, 1, 1], [], []>} : vector<1x64xbf16>, vector<64x32xbf16>, vector<1x32xf32> -> vector<1x32xf32>
    %c0_68 = arith.constant 0 : index
    %c0_69 = arith.constant 0 : index
    %157 = vector.load %arg11[%c0_68, %c0_69] : memref<1x32xf32, #tpu.memory_space<vmem>>, vector<1x32xf32>
    %158 = arith.addf %156, %157 : vector<1x32xf32>
    %cst_70 = arith.constant 0.000000e+00 : f32
    %159 = vector.broadcast %cst_70 : f32 to vector<1x32xf32>
    %160 = arith.maximumf %158, %159 : vector<1x32xf32>
    %161 = arith.truncf %160 : vector<1x32xf32> to vector<1x32xbf16>
    %c0_71 = arith.constant 0 : index
    %c0_72 = arith.constant 0 : index
    %162 = vector.load %arg12[%c0_71, %c0_72] : memref<32x16xbf16, #tpu.memory_space<vmem>>, vector<32x16xbf16>
    %cst_73 = arith.constant dense<0.000000e+00> : vector<1x16xf32>
    %163 = tpu.matmul %161, %162, %cst_73 {dimension_numbers = #tpu.dot_dimension_numbers<[1], [0], [0], [1], [0, 0, 1, 1], [], []>} : vector<1x32xbf16>, vector<32x16xbf16>, vector<1x16xf32> -> vector<1x16xf32>
    %c0_74 = arith.constant 0 : index
    %c0_75 = arith.constant 0 : index
    %164 = vector.load %arg13[%c0_74, %c0_75] : memref<1x16xf32, #tpu.memory_space<vmem>>, vector<1x16xf32>
    %165 = arith.addf %163, %164 : vector<1x16xf32>
    %cst_76 = arith.constant 0.000000e+00 : f32
    %166 = vector.broadcast %cst_76 : f32 to vector<1x16xf32>
    %167 = arith.maximumf %165, %166 : vector<1x16xf32>
    %168 = arith.truncf %167 : vector<1x16xf32> to vector<1x16xbf16>
    %c0_77 = arith.constant 0 : index
    %c0_78 = arith.constant 0 : index
    %169 = vector.load %arg14[%c0_77, %c0_78] : memref<16x2xbf16, #tpu.memory_space<vmem>>, vector<16x2xbf16>
    %cst_79 = arith.constant dense<0.000000e+00> : vector<1x2xf32>
    %170 = tpu.matmul %168, %169, %cst_79 {dimension_numbers = #tpu.dot_dimension_numbers<[1], [0], [0], [1], [0, 0, 1, 1], [], []>} : vector<1x16xbf16>, vector<16x2xbf16>, vector<1x2xf32> -> vector<1x2xf32>
    %c0_80 = arith.constant 0 : index
    %c0_81 = arith.constant 0 : index
    %171 = vector.load %arg15[%c0_80, %c0_81] : memref<1x2xf32, #tpu.memory_space<vmem>>, vector<1x2xf32>
    %172 = arith.addf %170, %171 : vector<1x2xf32>
    %c0_82 = arith.constant 0 : index
    %c0_83 = arith.constant 0 : index
    %c0_84 = arith.constant 0 : index
    %173 = vector.load %arg16[%c0_82, %c0_83, %c0_84] : memref<1x1x2xf32, #tpu.memory_space<vmem>>, vector<1x1x2xf32>
    %174 = vector.shape_cast %173 : vector<1x1x2xf32> to vector<1x2xf32>
    %175 = vector.shape_cast %172 : vector<1x2xf32> to vector<1x1x2xf32>
    tpu.vector_store %arg16[%c0_82, %c0_83, %c0_84], %175 {strides = array<i32>} : memref<1x1x2xf32, #tpu.memory_space<vmem>>, vector<1x1x2xf32>,
    return
  }
  func.func @transform_0(%arg0: i32) -> (i32, i32) {
    %c0_i32 = arith.constant 0 : i32
    %c0_i32_0 = arith.constant 0 : i32
    return %arg0, %c0_i32 : i32, i32
  }
  func.func @transform_1(%arg0: i32) -> (i32, i32) {
    %c0_i32 = arith.constant 0 : i32
    %c0_i32_0 = arith.constant 0 : i32
    %c0_i32_1 = arith.constant 0 : i32
    return %c0_i32, %c0_i32_0 : i32, i32
  }
  func.func @transform_2(%arg0: i32) -> (i32, i32) {
    %c0_i32 = arith.constant 0 : i32
    %c0_i32_0 = arith.constant 0 : i32
    %c0_i32_1 = arith.constant 0 : i32
    return %c0_i32, %c0_i32_0 : i32, i32
  }
  func.func @transform_3(%arg0: i32) -> (i32, i32) {
    %c0_i32 = arith.constant 0 : i32
    %c0_i32_0 = arith.constant 0 : i32
    %c0_i32_1 = arith.constant 0 : i32
    return %c0_i32, %c0_i32_0 : i32, i32
  }
  func.func @transform_4(%arg0: i32) -> (i32, i32) {
    %c0_i32 = arith.constant 0 : i32
    %c0_i32_0 = arith.constant 0 : i32
    %c0_i32_1 = arith.constant 0 : i32
    return %c0_i32, %c0_i32_0 : i32, i32
  }
  func.func @transform_5(%arg0: i32) -> (i32, i32) {
    %c0_i32 = arith.constant 0 : i32
    %c0_i32_0 = arith.constant 0 : i32
    %c0_i32_1 = arith.constant 0 : i32
    return %c0_i32, %c0_i32_0 : i32, i32
  }
  func.func @transform_6(%arg0: i32) -> (i32, i32) {
    %c0_i32 = arith.constant 0 : i32
    %c0_i32_0 = arith.constant 0 : i32
    %c0_i32_1 = arith.constant 0 : i32
    return %c0_i32, %c0_i32_0 : i32, i32
  }
  func.func @transform_7(%arg0: i32) -> (i32, i32) {
    %c0_i32 = arith.constant 0 : i32
    %c0_i32_0 = arith.constant 0 : i32
    %c0_i32_1 = arith.constant 0 : i32
    return %c0_i32, %c0_i32_0 : i32, i32
  }
  func.func @transform_8(%arg0: i32) -> (i32, i32) {
    %c0_i32 = arith.constant 0 : i32
    %c0_i32_0 = arith.constant 0 : i32
    %c0_i32_1 = arith.constant 0 : i32
    return %c0_i32, %c0_i32_0 : i32, i32
  }
  func.func @transform_9(%arg0: i32) -> (i32, i32) {
    %c0_i32 = arith.constant 0 : i32
    %c0_i32_0 = arith.constant 0 : i32
    %c0_i32_1 = arith.constant 0 : i32
    return %c0_i32, %c0_i32_0 : i32, i32
  }
  func.func @transform_10(%arg0: i32) -> (i32, i32) {
    %c0_i32 = arith.constant 0 : i32
    %c0_i32_0 = arith.constant 0 : i32
    %c0_i32_1 = arith.constant 0 : i32
    return %c0_i32, %c0_i32_0 : i32, i32
  }
  func.func @transform_11(%arg0: i32) -> (i32, i32) {
    %c0_i32 = arith.constant 0 : i32
    %c0_i32_0 = arith.constant 0 : i32
    %c0_i32_1 = arith.constant 0 : i32
    return %c0_i32, %c0_i32_0 : i32, i32
  }
  func.func @transform_12(%arg0: i32) -> (i32, i32) {
    %c0_i32 = arith.constant 0 : i32
    %c0_i32_0 = arith.constant 0 : i32
    %c0_i32_1 = arith.constant 0 : i32
    return %c0_i32, %c0_i32_0 : i32, i32
  }
  func.func @transform_13(%arg0: i32) -> (i32, i32) {
    %c0_i32 = arith.constant 0 : i32
    %c0_i32_0 = arith.constant 0 : i32
    %c0_i32_1 = arith.constant 0 : i32
    return %c0_i32, %c0_i32_0 : i32, i32
  }
  func.func @transform_14(%arg0: i32) -> (i32, i32) {
    %c0_i32 = arith.constant 0 : i32
    %c0_i32_0 = arith.constant 0 : i32
    %c0_i32_1 = arith.constant 0 : i32
    return %c0_i32, %c0_i32_0 : i32, i32
  }
  func.func @transform_15(%arg0: i32) -> (i32, i32, i32) {
    %c0_i32 = arith.constant 0 : i32
    %c0_i32_0 = arith.constant 0 : i32
    %c0_i32_1 = arith.constant 0 : i32
    return %arg0, %c0_i32, %c0_i32_0 : i32, i32, i32
  }
}

</mosaic_0001>

<bundles_post_ra>
// kernel: tpu_custom_call.1
= control target key start
LH: loop header
LB: loop body
LE: loop exit
PB: predicated region body
PF: predicated region fallthrough
CT: control target
= control target key end

     0   :  { %s4212_s0 = inlined_call_operand.vmem [shape: f32[128,1], index: 0, kind: input, shape index: {}]   ;;  %s4213_s1 = inlined_call_operand.vmem [shape: bf16[7,8], index: 1, kind: input, shape index: {}]   ;;  %s4214_s2 = inlined_call_operand.vmem [shape: f32[1,8], index: 2, kind: input, shape index: {}]   ;;  %s4215_s3 = inlined_call_operand.vmem [shape: bf16[56,8], index: 3, kind: input, shape index: {}]   ;;  %s4216_s4 = inlined_call_operand.vmem [shape: f32[1,8], index: 4, kind: input, shape index: {}]   ;;  %s4217_s5 = inlined_call_operand.vmem [shape: bf16[24,16], index: 5, kind: input, shape index: {}]   ;;  %s4218_s6 = inlined_call_operand.vmem [shape: f32[1,16], index: 6, kind: input, shape index: {}]   ;;  %s4219_s7 = inlined_call_operand.vmem [shape: bf16[48,16], index: 7, kind: input, shape index: {}]   ;;  %s4220_s8 = inlined_call_operand.vmem [shape: f32[1,16], index: 8, kind: input, shape index: {}]   ;;  %s4221_s9 = inlined_call_operand.vmem [shape: bf16[64,32], index: 9, kind: input, shape index: {}]   ;;  %s4222_s10 = inlined_call_operand.vmem [shape: f32[1,32], index: 10, kind: input, shape index: {}]   ;;  %s4223_s11 = inlined_call_operand.vmem [shape: bf16[32,16], index: 11, kind: input, shape index: {}]   ;;  %s4224_s12 = inlined_call_operand.vmem [shape: f32[1,16], index: 12, kind: input, shape index: {}]   ;;  %s4225_s13 = inlined_call_operand.vmem [shape: bf16[16,2], index: 13, kind: input, shape index: {}]   ;;  %s4226_s14 = inlined_call_operand.vmem [shape: f32[1,2], index: 14, kind: input, shape index: {}]   ;;  %s4227_s15 = inlined_call_operand.hbm [shape: f32[2,1,2], index: 15, kind: output, shape index: {}]  }
   0x1   :  { %4238 = sst [smem:[#allocation5_spill]] %s4212_s0 }
   0x2   :  { %4239 = sst [smem:[#allocation6_spill]] %s4213_s1 }
   0x3   :  { %4240 = sst [smem:[#allocation7_spill]] %s4214_s2 }
   0x4   :  { %4241 = sst [smem:[#allocation8_spill]] %s4215_s3 }
   0x5   :  { %20 = vsyncpa [#allocation3], 0 }
   0x6   :  { %22 = vsyncpa [#allocation3 + $0x1], 0  ;;  %s3316_s18 = smov 0   ;;  %s3318_s19 = smov 0  }
   0x7   :  { %s3320_s20 = smov 0   ;;  %s3322_s21 = smov 0  }
   0x8 LB: > { %s3337_s22 = sadd.s32 4294967295, %s3217_s21   ;;  %s2759_s23 = sadd.s32 4294967294, %s3217_s21   ;;  %s3217_s21 = sphi %s3322_s21, %s4262_s21   ;;  %s3213_s20 = sphi %s3320_s20, %s4261_s20   ;;  %s3209_s19 = sphi %s3318_s19, %s4260_s19   ;;  %s3205_s18 = sphi %s3316_s18, %s4259_s18  }
   0x9   : > { %s3341_s24 = sadd.s32 1, %s3217_s21   ;;  %s355_s25 = sadd.s32 1, %s3213_s20 }
   0xa   : > { %s352_s26 = ssub.s32 %s3217_s21, %s3341_s24  ;;  %p365_p0 = scmp.ne.s32.totalorder %s3213_s20, %s3209_s19 }
   0xb   : > { %p353_p1 = scmp.eq.s32.totalorder %s352_s26, 0  ;;  %p366_p2 = scmp.eq.s32.totalorder %s3337_s22, 1 }
   0xc   : > { %p371_p3 = scmp.ne.s32.totalorder %s3209_s19, %s3205_s18  ;;  %p372_p4 = scmp.eq.s32.totalorder %s2759_s23, 1 }
   0xd   : > { %s3352_s27 = scalar_select %p353_p1, %s3213_s20, %s355_s25  }
   0xe   : > { %p3354_p5 = por %p366_p2, %p365_p0  ;;  %p3358_p6 = por %p372_p4, %p371_p3 }
   0xf   : > { %p2762_p7 = scmp.ge.s32.totalorder %s3217_s21, 1  ;;  %p441_p8 = scmp.lt.s32.totalorder %s3217_s21, 3 }
  0x11   : > { %p442_p9 = pnand %p2762_p7, %p441_p8 }
  0x12   : > { %s2763_s30 = sshll.u32 (!%p442_p9), %s3337_s22, 3  ;;  %v503_v0 = vlaneseq (!%p442_p9)  ;;  %s4244_s0 = sld [smem:[#allocation5_spill]] (!%p442_p9)  ;;  %vm978_vm8 = vcmask (!%p442_p9), 1042432   ;;  %vm979_vm9 = vcmask (!%p442_p9), 1043456   ;;  %vm899_vm11 = vcmask (!%p442_p9), 7168  }
  0x13   : > { %445 = sbr.rel (%p442_p9) target bundleno = 2381 (0x94d), region = 80  ;;  %p489_p10 = scmp.lt.s32.totalorder (!%p442_p9), %s2763_s30, 15  ;;  %vm908_vm12 = vcmask (!%p442_p9), 15360   ;;  %vm917_vm13 = vcmask (!%p442_p9), 23552   ;;  %vm926_vm14 = vcmask (!%p442_p9), 31744   ;;  %vm935_vm15 = vcmask (!%p442_p9), 39936  }
  0x14   : > { %v3365_v1 = vshrl.u32 (!%p442_p9), %v503_v0, 7  ;;  %s3219_s26 = smov (!%p442_p9), 3   ;;  %s3222_s17 = smov (!%p442_p9), 4  }
  0x15   : > { %s3223_s23 = smov (!%p442_p9), 5   ;;  %s4245_s1 = sld [smem:[#allocation6_spill]] (!%p442_p9) }
  0x16   : > { %vm584_vm0 = vcmp.lt.s32.totalorder (!%p442_p9), %v3365_v1, 1  ;;  %vm552_vm1 = vcmp.lt.s32.totalorder (!%p442_p9), %v3365_v1, 2  ;;  %vm616_vm2 = vcmp.lt.s32.totalorder (!%p442_p9), %v3365_v1, 7  ;;  %vm649_vm3 = vcmp.lt.s32.totalorder (!%p442_p9), %v3365_v1, 6  ;;  %s4247_s2 = sld [smem:[#allocation7_spill]] (!%p442_p9)  ;;  %s4248_s3 = sld [smem:[#allocation8_spill]] (!%p442_p9) }
  0x17   : > { %vm682_vm4 = vcmp.lt.s32.totalorder (!%p442_p9), %v3365_v1, 5  ;;  %vm520_vm5 = vcmp.lt.s32.totalorder (!%p442_p9), %v3365_v1, 3 }
  0x1a   : > { %s4264_s30 = smov (!%p489_p10, %s2763_s30), 15 }
  0x1b   : > { %s2764_s16 = sshll.u32 %s4264_s30, 3  ;;  %s3220_s30 = smov 2  }
  0x1c   : > { %s3370_s25 = scalar_lea.vmem %s4244_s0, %s2764_s16  ;;  %s3221_s16 = smov 1  }
  0x1d   : > { %v3374_v2 = vld [vmem:[%s3370_s25 + $0x10] sm:$0xff]  ;;  %v3377_v3 = vld [vmem:[%s3370_s25 + $0x18] sm:$0xff]  ;;  %v3380_v4 = vld [vmem:[%s3370_s25] sm:$0xff]  ;;  %s4258_s0 = smov 48  }
  0x1e   : > { %v2954_v5 = vpack.i.bf16 %v3377_v3, %v3374_v2  ;;  %v3388_v6 = vld [vmem:[%s3370_s25 + $0x8] sm:$0xff]  ;;  %v578_v7 = vrot.slane %v3374_v2, 7  ;;  %v579_v8 = vrot.slane %v3377_v3, 7  ;;  %v546_v9 = vrot.slane %v3374_v2, 6  ;;  %v3394_v10 = vld [vmem:[%s3370_s25 + $0x20] sm:$0xff]  ;;  %v3410_v19 = vld [vmem:[%s3370_s25 + $0x38] sm:$0xff] }
  0x1f   : > { %v2949_v11 = vpack.i.bf16 %v3388_v6, %v3380_v4  ;;  %v577_v12 = vrot.slane %v3388_v6, 7  ;;  %v545_v13 = vrot.slane %v3388_v6, 6  ;;  %v547_v14 = vrot.slane %v3377_v3, 6  ;;  %v3473_v55 = vld [vmem:[%s3370_s25 + $0x28] sm:$0xff]  ;;  %v3476_v56 = vld [vmem:[%s3370_s25 + $0x30] sm:$0xff]  ;;  %s4228_s25 = smov 6  }
  0x20   : > { %2955 = vrot.lane.b32.xlu1 %v2954_v5, %s3219_s26  ;;  %v589_v15 = vsel %vm584_vm0, %v578_v7, %v579_v8  ;;  %v610_v16 = vrot.slane %v3374_v2, 1  ;;  %v611_v17 = vrot.slane %v3377_v3, 1  ;;  %v612_v18 = vrot.slane %v3394_v10, 1 }
  0x21   : > { %2950 = vrot.lane.b32.xlu0 %v2949_v11, %s3219_s26  ;;  %v590_v20 = vsel %vm584_vm0, %v577_v12, %v578_v7  ;;  %v557_v21 = vsel %vm552_vm1, %v546_v9, %v547_v14  ;;  %v558_v22 = vsel %vm552_vm1, %v545_v13, %v546_v9  ;;  %v608_v23 = vrot.slane %v3380_v4, 1 }
  0x22   : > { %v2964_v24 = vpack.i.bf16 %v589_v15, %v590_v20  ;;  %v2959_v25 = vpack.i.bf16 %v557_v21, %v558_v22  ;;  %v620_v26 = vsel %vm616_vm2, %v611_v17, %v612_v18  ;;  %v621_v27 = vsel %vm616_vm2, %v610_v16, %v611_v17 }
  0x23   : > { %v2974_v28 = vpack.i.bf16 %v620_v26, %v621_v27  ;;  %v609_v29 = vrot.slane %v3388_v6, 1  ;;  %v576_v30 = vrot.slane %v3380_v4, 7  ;;  %v583_v31 = vrot.slane %v3410_v19, 7 }
  0x24   : > { %2965 = vrot.lane.b32.xlu1 %v2964_v24, %s3220_s30  ;;  %v544_v32 = vrot.slane %v3380_v4, 6  ;;  %v551_v33 = vrot.slane %v3410_v19, 6  ;;  %v643_v34 = vrot.slane %v3374_v2, 2  ;;  %v644_v35 = vrot.slane %v3377_v3, 2 }
  0x25   : > { %2960 = vrot.lane.b32.xlu0 %v2959_v25, %s3221_s16  ;;  %v622_v36 = vsel %vm616_vm2, %v609_v29, %v610_v16  ;;  %v623_v37 = vsel %vm616_vm2, %v608_v23, %v609_v29  ;;  %v591_v38 = vsel %vm584_vm0, %v576_v30, %v577_v12  ;;  %v592_v39 = vsel %vm584_vm0, %v583_v31, %v576_v30 }
  0x26   : > { %v2969_v40 = vpack.i.bf16 %v622_v36, %v623_v37  ;;  %v600_v41 = vsel %vm584_vm0, 0.0, %v592_v39  ;;  %v559_v42 = vsel %vm552_vm1, %v544_v32, %v545_v13  ;;  %v560_v43 = vsel %vm552_vm1, %v551_v33, %v544_v32 }
  0x27   : > { %v2989_v44 = vpack.i.bf16 %v591_v38, %v600_v41  ;;  %v568_v45 = vsel %vm552_vm1, 0.0, %v560_v43  ;;  %v645_v46 = vrot.slane %v3394_v10, 2  ;;  %v654_v47 = vsel %vm649_vm3, %v643_v34, %v644_v35 }
  0x28   : > { %2975 = vrot.lane.b32.xlu1 %v2974_v28, %s3222_s17  ;;  %v641_v48 = vrot.slane %v3380_v4, 2  ;;  %v642_v49 = vrot.slane %v3388_v6, 2  ;;  %v676_v50 = vrot.slane %v3374_v2, 3  ;;  %v2979_v51 = vpack.i.bf16 %v559_v42, %v568_v45 }
  0x29   : > { %2970 = vrot.lane.b32.xlu0 %v2969_v40, %s3222_s17  ;;  %v653_v52 = vsel %vm649_vm3, %v644_v35, %v645_v46  ;;  %v677_v53 = vrot.slane %v3377_v3, 3  ;;  %v678_v54 = vrot.slane %v3394_v10, 3  ;;  %v674_v59 = vrot.slane %v3380_v4, 3 }
  0x2a   : > { %v655_v57 = vsel %vm649_vm3, %v642_v49, %v643_v34  ;;  %v656_v58 = vsel %vm649_vm3, %v641_v48, %v642_v49  ;;  %v675_v60 = vrot.slane %v3388_v6, 3  ;;  %v2994_v61 = vpack.i.bf16 %v653_v52, %v654_v47 }
  0x2b   : > { %v686_v62 = vsel %vm682_vm4, %v677_v53, %v678_v54  ;;  %v687_v63 = vsel %vm682_vm4, %v676_v50, %v677_v53  ;;  %v549_v0 = vrot.slane %v3473_v55, 6  ;;  %v550_v5 = vrot.slane %v3476_v56, 6 }
  0x2c   : > { %2990 = vrot.lane.b32.xlu1 %v2989_v44, %s3220_s30  ;;  %v2984_v7 = vpack.i.bf16 %v655_v57, %v656_v58  ;;  %v688_v9 = vsel %vm682_vm4, %v675_v60, %v676_v50  ;;  %v689_v11 = vsel %vm682_vm4, %v674_v59, %v675_v60  ;;  %v548_v12 = vrot.slane %v3394_v10, 6 }
  0x2d   : > { %2980 = vrot.lane.b32.xlu0 %v2979_v51, %s3221_s16  ;;  %v3004_v13 = vpack.i.bf16 %v686_v62, %v687_v63  ;;  %v581_v15 = vrot.slane %v3473_v55, 7  ;;  %v553_v16 = vsel %vm552_vm1, %v550_v5, %v551_v33  ;;  %v554_v17 = vsel %vm552_vm1, %v549_v0, %v550_v5 }
  0x2e   : > { %v582_v20 = vrot.slane %v3476_v56, 7  ;;  %v580_v21 = vrot.slane %v3394_v10, 7  ;;  %v2999_v22 = vpack.i.bf16 %v688_v9, %v689_v11  ;;  %v555_v24 = vsel %vm552_vm1, %v548_v12, %v549_v0 }
  0x2f   : > { %v556_v25 = vsel %vm552_vm1, %v547_v14, %v548_v12  ;;  %v3519_v26 = vadd.s32 56, %v3365_v1  ;;  %v3014_v27 = vpack.i.bf16 %v553_v16, %v554_v17  ;;  %v614_v33 = vrot.slane %v3476_v56, 1 }
  0x30   : > { %2995 = vrot.lane.b32.xlu1 %v2994_v61, %s3223_s23  ;;  %v585_v28 = vsel %vm584_vm0, %v582_v20, %v583_v31  ;;  %v586_v29 = vsel %vm584_vm0, %v581_v15, %v582_v20  ;;  %v587_v30 = vsel %vm584_vm0, %v580_v21, %v581_v15  ;;  %v588_v14 = vsel %vm584_vm0, %v579_v8, %v580_v21 }
  0x31   : > { %2985 = vrot.lane.b32.xlu0 %v2984_v7, %s3223_s23  ;;  %v3009_v32 = vpack.i.bf16 %v555_v24, %v556_v25  ;;  %v615_v31 = vrot.slane %v3410_v19, 1  ;;  %vm632_vm6 = vcmp.ge.s32.totalorder %v3519_v26, 63  ;;  %vm665_vm7 = vcmp.ge.s32.totalorder %v3519_v26, 62 }
  0x32   : > { %v3024_v34 = vpack.i.bf16 %v585_v28, %v586_v29  ;;  %v3019_v35 = vpack.i.bf16 %v587_v30, %v588_v14  ;;  %v3034_v36 = vpack.i.bf16 %v3410_v19, %v3476_v56  ;;  %v3029_v8 = vpack.i.bf16 %v3473_v55, %v3394_v10 }
  0x33   : > { %v613_v37 = vrot.slane %v3473_v55, 1  ;;  %v647_v38 = vrot.slane %v3476_v56, 2  ;;  %v648_v39 = vrot.slane %v3410_v19, 2  ;;  %v513_v40 = vrot.slane %v3388_v6, 5 }
  0x34   : > { %3005 = vrot.lane.b32.xlu1 %v3004_v13, %s4228_s25  ;;  %v646_v41 = vrot.slane %v3473_v55, 2  ;;  %v681_v42 = vrot.slane %v3410_v19, 3  ;;  %v514_v43 = vrot.slane %v3374_v2, 5  ;;  %v515_v44 = vrot.slane %v3377_v3, 5 }
  0x35   : > { %3000 = vrot.lane.b32.xlu0 %v2999_v22, %s4228_s25  ;;  %v617_v45 = vsel %vm616_vm2, %v614_v33, %v615_v31  ;;  %v624_v47 = vsel %vm616_vm2, %v615_v31, %v608_v23  ;;  %v519_v6 = vrot.slane %v3410_v19, 5  ;;  %v512_v49 = vrot.slane %v3380_v4, 5  ;;  %v957_v23 = vld [vmem:[%s4245_s1] sm:$0xf]  ;;  %s4232_s25 = smov 8   ;;  %s3235_s1 = smov [#allocation2]  }
  0x36   : > { %v3564_v50 = vsel %vm520_vm5, %v514_v43, %v515_v44  ;;  %v3568_v2 = vsel %vm520_vm5, %v513_v40, %v514_v43  ;;  %v517_v51 = vrot.slane %v3473_v55, 5  ;;  %v640_v52 = vsel %vm632_vm6, 0.0, %v624_v47 }
  0x37   : > { %v3573_v3 = vsel %vm520_vm5, %v512_v49, %v513_v40  ;;  %v3577_v19 = vsel %vm520_vm5, %v519_v6, %v512_v49  ;;  %v3225_v53 = vmov 65535   ;;  %v518_v58 = vrot.slane %v3476_v56, 5 }
  0x38   : > { %3015 = vrot.lane.b32.xlu1 %v3014_v27, %s3221_s16  ;;  %v980_v57 = vsel %vm978_vm8, 4294967295, %v3225_v53  ;;  %v516_v60 = vrot.slane %v3394_v10, 5  ;;  %v618_v61 = vsel %vm616_vm2, %v613_v37, %v614_v33  ;;  %v619_v62 = vsel %vm616_vm2, %v612_v18, %v613_v37 }
  0x39   : > { %3010 = vrot.lane.b32.xlu0 %v3009_v32, %s3221_s16  ;;  %v657_v63 = vsel %vm649_vm3, %v648_v39, %v641_v48  ;;  %v981_v0 = vsel %vm979_vm9, %v980_v57, 0  ;;  %v3601_v7 = vsel %vm520_vm5, %v518_v58, %v519_v6  ;;  %v3605_v9 = vsel %vm520_vm5, %v517_v51, %v518_v58  ;;  %s4236_s16 = smov 16  }
  0x3a   : > { %v983_v5 = vand.u32 %v981_v0, %v957_v23  ;;  %v3609_v11 = vsel %vm520_vm5, %v516_v60, %v517_v51  ;;  %v3044_v18 = vpack.i.bf16 %v640_v52, %v617_v45  ;;  %vm698_vm10 = vcmp.ge.s32.totalorder %v3519_v26, 61 }
  0x3b   : > { %v3615_v48 = vsel %vm520_vm5, %v515_v44, %v516_v60  ;;  %v3039_v12 = vpack.i.bf16 %v618_v61, %v619_v62  ;;  %v650_v13 = vsel %vm649_vm3, %v647_v38, %v648_v39  ;;  %v673_v15 = vsel %vm665_vm7, 0.0, %v657_v63 }
  0x3c   : > { %3025 = vrot.lane.b32.xlu1 %v3024_v34, %s3220_s30  ;;  %v680_v16 = vrot.slane %v3476_v56, 3  ;;  %2827 = vmatprep.subr.bf16.mxu1 %v983_v5  ;;  %v651_v17 = vsel %vm649_vm3, %v646_v41, %v647_v38  ;;  %v652_v20 = vsel %vm649_vm3, %v645_v46, %v646_v41  ;;  %v690_v21 = vsel %vm682_vm4, %v681_v42, %v674_v59 }
  0x3d   : > { %3020 = vrot.lane.b32.xlu0 %v3019_v35, %s3220_s30  ;;  %v679_v22 = vrot.slane %v3473_v55, 3  ;;  %2828 = vmatpush3.bf16.msra.mxu1 %v983_v5  ;;  %v3054_v56 = vpack.i.bf16 %v673_v15, %v650_v13  ;;  %v3049_v24 = vpack.i.bf16 %v651_v17, %v652_v20  ;;  %v706_v46 = vsel %vm698_vm10, 0.0, %v690_v21  ;;  %s4257_s30 = smov 32  }
  0x3e   : > { %v683_v25 = vsel %vm682_vm4, %v680_v16, %v681_v42  ;;  %vm944_vm6 = vcmask 48128   ;;  %vm965_vm7 = vcmask 56320   ;;  %vm1234_vm8 = vcmask 58368  }
  0x3f   : > { %v684_v4 = vsel %vm682_vm4, %v679_v22, %v680_v16  ;;  %v685_v55 = vsel %vm682_vm4, %v678_v54, %v679_v22  ;;  %v3064_v59 = vpack.i.bf16 %v706_v46, %v683_v25  ;;  %vm1491_vm10 = vcmask 1041409  }
  0x40   : > { %3035 = vrot.lane.b32.xlu1 %v3034_v36, %s3219_s26  ;;  %v3059_v27 = vpack.i.bf16 %v684_v4, %v685_v55 }
  0x41   : > { %3030 = vrot.lane.b32.xlu0 %v3029_v8, %s3219_s26  ;;  %s4246_s26 = smov 6   ;;  %v536_v8 = vsel %vm520_vm5, 0.0, %v3577_v19 }
  0x44   : > { %3045 = vrot.lane.b32.xlu1 %v3044_v18, %s3222_s17 }
  0x45   : > { %3040 = vrot.lane.b32.xlu0 %v3039_v12, %s3222_s17  ;;  %s2796_s17 = sshll.u32 %s3337_s22, 4 }
  0x48   : > { %3055 = vrot.lane.b32.xlu1 %v3054_v56, %s3223_s23 }
  0x49   : > { %3050 = vrot.lane.b32.xlu0 %v3049_v24, %s3223_s23  ;;  %s3227_s23 = smov 24  }
  0x4c   : > { %3065 = vrot.lane.b32.xlu1 %v3064_v59, %s4246_s26 }
  0x4d   : > { %3060 = vrot.lane.b32.xlu0 %v3059_v27, %s4246_s26  ;;  %s4234_s26 = smov 32  }
  0x92   : > { %v2956_v26 = vpop.permute.xlu1 %2955 }
  0x93   : > { %v2951_v28 = vpop.permute.xlu0 %2950  ;;  %v2958_v42 = vunpack.i.h.bf16 %v2956_v26  ;;  %v2957_v43 = vunpack.i.l.bf16 %v2956_v26 }
  0x94   : > { %v2953_v47 = vunpack.i.h.bf16 %v2951_v28  ;;  %v2952_v6 = vunpack.i.l.bf16 %v2951_v28 }
  0x96   : > { %v2966_v29 = vpop.permute.xlu1 %2965 }
  0x97   : > { %v2961_v30 = vpop.permute.xlu0 %2960  ;;  %v2968_v33 = vunpack.i.h.bf16 %v2966_v29  ;;  %v2967_v54 = vunpack.i.l.bf16 %v2966_v29 }
  0x98   : > { %v2963_v14 = vunpack.i.h.bf16 %v2961_v30  ;;  %v2962_v32 = vunpack.i.l.bf16 %v2961_v30 }
  0x9a   : > { %v2976_v10 = vpop.permute.xlu1 %2975  ;;  %v903_v34 = vsel %vm899_vm11, %v3564_v50, %v2963_v14  ;;  %v902_v35 = vsel %vm899_vm11, %v3568_v2, %v2962_v32 }
  0x9b   : > { %v2971_v31 = vpop.permute.xlu0 %2970  ;;  %v912_v37 = vsel %vm908_vm12, %v903_v34, %v2968_v33  ;;  %v911_v38 = vsel %vm908_vm12, %v902_v35, %v2967_v54  ;;  %v2978_v49 = vunpack.i.h.bf16 %v2976_v10  ;;  %v2977_v50 = vunpack.i.l.bf16 %v2976_v10 }
  0x9c   : > { %v920_v2 = vsel %vm917_vm13, %v911_v38, %v2957_v43  ;;  %v921_v23 = vsel %vm917_vm13, %v912_v37, %v2958_v42  ;;  %v2973_v53 = vunpack.i.h.bf16 %v2971_v31  ;;  %v2972_v57 = vunpack.i.l.bf16 %v2971_v31 }
  0x9d   : > { %v929_v16 = vsel %vm926_vm14, %v920_v2, %v2977_v50  ;;  %v930_v17 = vsel %vm926_vm14, %v921_v23, %v2978_v49 }
  0x9e   : > { %v2991_v36 = vpop.permute.xlu1 %2990 }
  0x9f   : > { %v2993_v39 = vunpack.i.h.bf16 %v2991_v36  ;;  %v2992_v40 = vunpack.i.l.bf16 %v2991_v36  ;;  %v2981_v41 = vpop.permute.xlu0 %2980 }
  0xa0   : > { %v2983_v44 = vunpack.i.h.bf16 %v2981_v41  ;;  %v2982_v45 = vunpack.i.l.bf16 %v2981_v41 }
  0xa2   : > { %v900_v19 = vsel %vm899_vm11, %v536_v8, %v2982_v45  ;;  %v901_v51 = vsel %vm899_vm11, %v3573_v3, %v2983_v44  ;;  %v2996_v52 = vpop.permute.xlu1 %2995 }
  0xa3   : > { %v909_v58 = vsel %vm908_vm12, %v900_v19, %v2992_v40  ;;  %v910_v60 = vsel %vm908_vm12, %v901_v51, %v2993_v39  ;;  %v2986_v61 = vpop.permute.xlu0 %2985  ;;  %v2998_v62 = vunpack.i.h.bf16 %v2996_v52  ;;  %v2997_v63 = vunpack.i.l.bf16 %v2996_v52 }
  0xa4   : > { %v918_v0 = vsel %vm917_vm13, %v909_v58, %v2952_v6  ;;  %v919_v5 = vsel %vm917_vm13, %v910_v60, %v2953_v47  ;;  %v2988_v18 = vunpack.i.h.bf16 %v2986_v61  ;;  %v2987_v12 = vunpack.i.l.bf16 %v2986_v61 }
  0xa5   : > { %v927_v3 = vsel %vm926_vm14, %v918_v0, %v2972_v57  ;;  %v928_v15 = vsel %vm926_vm14, %v919_v5, %v2973_v53  ;;  %v939_v56 = vsel %vm935_vm15, %v930_v17, %v2998_v62  ;;  %v938_v24 = vsel %vm935_vm15, %v929_v16, %v2997_v63 }
  0xa6   : > { %v3006_v13 = vpop.permute.xlu1 %3005  ;;  %v936_v59 = vsel %vm935_vm15, %v927_v3, %v2987_v12  ;;  %v937_v27 = vsel %vm935_vm15, %v928_v15, %v2988_v18 }
  0xa7   : > { %v3008_v20 = vunpack.i.h.bf16 %v3006_v13  ;;  %v3007_v21 = vunpack.i.l.bf16 %v3006_v13  ;;  %v3001_v22 = vpop.permute.xlu0 %3000 }
  0xa8   : > { %v3003_v25 = vunpack.i.h.bf16 %v3001_v22  ;;  %v3002_v46 = vunpack.i.l.bf16 %v3001_v22 }
  0xa9   : > { %v947_v4 = vsel %vm944_vm6, %v938_v24, %v3007_v21  ;;  %v948_v55 = vsel %vm944_vm6, %v939_v56, %v3008_v20 }
  0xaa   : > { %v954_v26 = vpack.c.bf16 %v948_v55, %v947_v4  ;;  %v3016_v28 = vpop.permute.xlu1 %3015  ;;  %v945_v29 = vsel %vm944_vm6, %v936_v59, %v3002_v46  ;;  %v946_v30 = vsel %vm944_vm6, %v937_v27, %v3003_v25 }
  0xab   : > { %v3011_v14 = vpop.permute.xlu0 %3010  ;;  %v953_v32 = vpack.c.bf16 %v946_v30, %v945_v29  ;;  %v3018_v34 = vunpack.i.h.bf16 %v3016_v28  ;;  %v3017_v35 = vunpack.i.l.bf16 %v3016_v28  ;;  %v3226_v30 = vmov 1983009808  }
  0xac   : > { %v3013_v36 = vunpack.i.h.bf16 %v3011_v14  ;;  %v3012_v8 = vunpack.i.l.bf16 %v3011_v14  ;;  %v1068_v14 = vunpack.c.l.s4 %v3226_v30 }
  0xad   : > { %2829 = vmatprep.mubr.msk.bf16.mxu1 %vm965_vm7, %v953_v32  ;;  %v907_v41 = vsel %vm899_vm11, %v3601_v7, %v3018_v34  ;;  %v906_v42 = vsel %vm899_vm11, %v3605_v9, %v3017_v35 }
  0xae   : > { %2830 = vmatmul.mubr.msk.bf16.vlgmr.msra.gmra.mrb[0].mxu1 %vm965_vm7, %v954_v26  ;;  %v3026_v10 = vpop.permute.xlu1 %3025  ;;  %v905_v45 = vsel %vm899_vm11, %v3609_v11, %v3013_v36  ;;  %v904_v47 = vsel %vm899_vm11, %v3615_v48, %v3012_v8  ;;  %v1069_v32 = vunpack.c.0.s8 %v1068_v14  ;;  %vm1493_vm11 = vcmask 1042434  }
  0xaf   : > { %v3021_v33 = vpop.permute.xlu0 %3020  ;;  %v3028_v38 = vunpack.i.h.bf16 %v3026_v10  ;;  %v3027_v39 = vunpack.i.l.bf16 %v3026_v10  ;;  %v3715_v10 = vld [vmem:[%s4247_s2] ss:$0 sm:$0xff]  ;;  %s4170_s2 = scalar_lea.hbm %s4227_s15, %s2796_s17 }
  0xb0   : > { %v3023_v43 = vunpack.i.h.bf16 %v3021_v33  ;;  %v3022_v44 = vunpack.i.l.bf16 %v3021_v33 }
  0xb1   : > { %v915_v7 = vsel %vm908_vm12, %v906_v42, %v3027_v39  ;;  %v916_v52 = vsel %vm908_vm12, %v907_v41, %v3028_v38 }
  0xb2   : > { %v3036_v54 = vpop.permute.xlu1 %3035  ;;  %v913_v58 = vsel %vm908_vm12, %v904_v47, %v3022_v44  ;;  %v914_v11 = vsel %vm908_vm12, %v905_v45, %v3023_v43  ;;  %vm4230_vm12 = vcmask 1043459  }
  0xb3   : > { %v3031_v31 = vpop.permute.xlu0 %3030  ;;  %v3038_v6 = vunpack.i.h.bf16 %v3036_v54  ;;  %v3037_v49 = vunpack.i.l.bf16 %v3036_v54  ;;  %v3718_v54 = vsub.s32 %v1069_v32, %v3365_v1 }
  0xb4   : > { %v3033_v50 = vunpack.i.h.bf16 %v3031_v31  ;;  %v3032_v2 = vunpack.i.l.bf16 %v3031_v31 }
  0xb5   : > { %v924_v61 = vsel %vm917_vm13, %v915_v7, %v3037_v49  ;;  %v925_v62 = vsel %vm917_vm13, %v916_v52, %v3038_v6  ;;  %v3731_v6 = vadd.s32 24, %v3365_v1 }
  0xb6   : > { %v3046_v37 = vpop.permute.xlu1 %3045  ;;  %v922_v5 = vsel %vm917_vm13, %v913_v58, %v3032_v2  ;;  %v923_v18 = vsel %vm917_vm13, %v914_v11, %v3033_v50  ;;  %vm4231_vm13 = vcmask 1044484  }
  0xb7   : > { %v3041_v40 = vpop.permute.xlu0 %3040  ;;  %v3048_v23 = vunpack.i.h.bf16 %v3046_v37  ;;  %v3047_v19 = vunpack.i.l.bf16 %v3046_v37 }
  0xb8   : > { %v3043_v9 = vunpack.i.h.bf16 %v3041_v40  ;;  %v3042_v53 = vunpack.i.l.bf16 %v3041_v40 }
  0xb9   : > { %v933_v12 = vsel %vm926_vm14, %v924_v61, %v3047_v19  ;;  %v934_v13 = vsel %vm926_vm14, %v925_v62, %v3048_v23 }
  0xba   : > { %v3056_v51 = vpop.permute.xlu1 %3055  ;;  %v931_v15 = vsel %vm926_vm14, %v922_v5, %v3042_v53  ;;  %v932_v16 = vsel %vm926_vm14, %v923_v18, %v3043_v9  ;;  %vm1499_vm14 = vcmask 1045509  }
  0xbb   : > { %v3051_v57 = vpop.permute.xlu0 %3050  ;;  %v3058_v60 = vunpack.i.h.bf16 %v3056_v51  ;;  %v3057_v48 = vunpack.i.l.bf16 %v3056_v51 }
  0xbc   : > { %v3053_v63 = vunpack.i.h.bf16 %v3051_v57  ;;  %v3052_v0 = vunpack.i.l.bf16 %v3051_v57 }
  0xbd   : > { %v942_v22 = vsel %vm935_vm15, %v933_v12, %v3057_v48  ;;  %v943_v56 = vsel %vm935_vm15, %v934_v13, %v3058_v60 }
  0xbe   : > { %v3066_v3 = vpop.permute.xlu1 %3065  ;;  %v940_v46 = vsel %vm935_vm15, %v931_v15, %v3052_v0  ;;  %v941_v4 = vsel %vm935_vm15, %v932_v16, %v3053_v63  ;;  %vm1501_vm15 = vcmask 1046534  }
  0xbf   : > { %v3068_v17 = vunpack.i.h.bf16 %v3066_v3  ;;  %v3067_v20 = vunpack.i.l.bf16 %v3066_v3  ;;  %v3061_v21 = vpop.permute.xlu0 %3060 }
  0xc0   : > { %v3063_v24 = vunpack.i.h.bf16 %v3061_v21  ;;  %v3062_v25 = vunpack.i.l.bf16 %v3061_v21 }
  0xc1   : > { %v951_v55 = vsel %vm944_vm6, %v942_v22, %v3067_v20  ;;  %v952_v59 = vsel %vm944_vm6, %v943_v56, %v3068_v17 }
  0xc2   : > { %v956_v27 = vpack.c.bf16 %v952_v59, %v951_v55  ;;  %v949_v26 = vsel %vm944_vm6, %v940_v46, %v3062_v25  ;;  %v950_v28 = vsel %vm944_vm6, %v941_v4, %v3063_v24  ;;  %vm1503_vm6 = vcmask 1047559  }
  0xc3   : > { %v955_v29 = vpack.c.bf16 %v950_v28, %v949_v26 }
  0xc5   : > { %2833 = vmatprep.mubr.msk.bf16.mxu1 %vm965_vm7, %v955_v29 }
  0xc6   : > { %2834 = vmatmul.mubr.msk.bf16.gmra.mrb[4].mxu1 %vm965_vm7, %v956_v27  ;;  %vm1601_vm7 = vcmp.ge.s32.totalorder %v3731_v6, 31 }
 0x181   : > { %v2831_v33 = vpop.f32.mrb[0].mxu1 }
 0x182   : > { %v1028_v31 = vadd.f32 %v2831_v33, %v3715_v10  ;;  %v1019_v34 = vpop.f32.mrb[1].mxu1 }
 0x183   : > { %v1020_v35 = vadd.f32 %v3715_v10, %v1019_v34  ;;  %v2832_v36 = vpop.f32.mrb[2].mxu1 }
 0x184   : > { %v1052_v8 = vmax.f32 %v1028_v31, 0.0  ;;  %v1031_v37 = vadd.f32 %v2832_v36, %v3715_v10  ;;  %v1022_v38 = vpop.f32.mrb[3].mxu1 }
 0x185   : > { %v1050_v39 = vmax.f32 %v1020_v35, 0.0  ;;  %v1023_v40 = vadd.f32 %v3715_v10, %v1022_v38 }
 0x186   : > { %v1100_v41 = vcombine.high %v1052_v8, %v1052_v8  ;;  %v1107_v42 = vrot.slane %v1052_v8, %v3718_v54  ;;  %v3725_v43 = vmax.f32 %v1031_v37, 0.0 }
 0x187   : > { %v1066_v44 = vcombine.high %v1050_v39, %v1050_v39  ;;  %v1073_v45 = vrot.slane %v1050_v39, %v3718_v54  ;;  %v3728_v47 = vmax.f32 %v1023_v40, 0.0 }
 0x188   : > { %v1114_v49 = vrot.slane %v1100_v41, %v3718_v54  ;;  %v1115_v50 = vcombine.high %v1107_v42, %v1107_v42  ;;  %v1291_v2 = vsel %vm1234_vm8, %v1107_v42, -inf  ;;  %v1117_v23 = vcombine.high %v3725_v43, %v3725_v43 }
 0x189   : > { %v1292_v19 = vrot.slane %v1291_v2, 4  ;;  %v1080_v51 = vrot.slane %v1066_v44, %v3718_v54  ;;  %v1081_v7 = vcombine.high %v1073_v45, %v1073_v45  ;;  %v1235_v52 = vsel %vm1234_vm8, %v1073_v45, -inf }
 0x18a   : > { %v1116_v9 = vcombine.high %v1114_v49, %v1114_v49  ;;  %v1298_v53 = vsel %vm1234_vm8, %v1115_v50, -inf  ;;  %v1305_v57 = vsel %vm1234_vm8, %v1114_v49, -inf  ;;  %v1236_v58 = vrot.slane %v1235_v52, 4 }
 0x18b   : > { %v1293_v11 = vmax.f32 %v1291_v2, %v1292_v19  ;;  %v1299_v60 = vrot.slane %v1298_v53, 4  ;;  %v1306_v48 = vrot.slane %v1305_v57, 4  ;;  %v1082_v61 = vcombine.high %v1080_v51, %v1080_v51 }
 0x18c   : > { %v1312_v62 = vsel %vm1234_vm8, %v1116_v9, -inf  ;;  %v1237_v63 = vmax.f32 %v1235_v52, %v1236_v58  ;;  %v1242_v0 = vsel %vm1234_vm8, %v1081_v7, -inf  ;;  %v1249_v5 = vsel %vm1234_vm8, %v1080_v51, -inf }
 0x18d   : > { %v1294_v18 = vrot.slane %v1293_v11, 2  ;;  %v1300_v12 = vmax.f32 %v1298_v53, %v1299_v60  ;;  %v1307_v13 = vmax.f32 %v1305_v57, %v1306_v48  ;;  %v1313_v3 = vrot.slane %v1312_v62, 4 }
 0x18e   : > { %v1238_v15 = vrot.slane %v1237_v63, 2  ;;  %v1243_v16 = vrot.slane %v1242_v0, 4  ;;  %v1250_v17 = vrot.slane %v1249_v5, 4  ;;  %v1256_v20 = vsel %vm1234_vm8, %v1082_v61, -inf }
 0x18f   : > { %v1295_v21 = vmax.f32 %v1293_v11, %v1294_v18  ;;  %v1301_v22 = vrot.slane %v1300_v12, 2  ;;  %v1308_v56 = vrot.slane %v1307_v13, 2  ;;  %v1314_v24 = vmax.f32 %v1312_v62, %v1313_v3 }
 0x190   : > { %v1239_v25 = vmax.f32 %v1237_v63, %v1238_v15  ;;  %v1244_v46 = vmax.f32 %v1242_v0, %v1243_v16  ;;  %v1251_v4 = vmax.f32 %v1249_v5, %v1250_v17  ;;  %v1257_v55 = vrot.slane %v1256_v20, 4 }
 0x191   : > { %v1296_v59 = vrot.slane %v1295_v21, 1  ;;  %v1302_v27 = vmax.f32 %v1300_v12, %v1301_v22  ;;  %v1309_v26 = vmax.f32 %v1307_v13, %v1308_v56  ;;  %v1315_v28 = vrot.slane %v1314_v24, 2 }
 0x192   : > { %v1240_v29 = vrot.slane %v1239_v25, 1  ;;  %v1245_v30 = vrot.slane %v1244_v46, 2  ;;  %v1252_v14 = vrot.slane %v1251_v4, 2  ;;  %v1258_v32 = vmax.f32 %v1256_v20, %v1257_v55 }
 0x193   : > { %v1297_v33 = vmax.f32 %v1295_v21, %v1296_v59  ;;  %v1303_v31 = vrot.slane %v1302_v27, 1  ;;  %v1310_v34 = vrot.slane %v1309_v26, 1  ;;  %v1316_v35 = vmax.f32 %v1314_v24, %v1315_v28 }
 0x194   : > { %v1241_v36 = vmax.f32 %v1239_v25, %v1240_v29  ;;  %v1246_v8 = vmax.f32 %v1244_v46, %v1245_v30  ;;  %v1253_v37 = vmax.f32 %v1251_v4, %v1252_v14  ;;  %v1259_v38 = vrot.slane %v1258_v32, 2 }
 0x195   : > { %v1304_v39 = vmax.f32 %v1302_v27, %v1303_v31  ;;  %v1311_v40 = vmax.f32 %v1309_v26, %v1310_v34  ;;  %v1317_v41 = vrot.slane %v1316_v35, 1  ;;  %v1124_v42 = vrot.slane %v3725_v43, %v3718_v54 }
 0x196   : > { %v1247_v44 = vrot.slane %v1246_v8, 1  ;;  %v1254_v45 = vrot.slane %v1253_v37, 1  ;;  %v1260_v49 = vmax.f32 %v1258_v32, %v1259_v38  ;;  %v1131_v50 = vrot.slane %v1117_v23, %v3718_v54 }
 0x197   : > { %v1318_v2 = vmax.f32 %v1316_v35, %v1317_v41  ;;  %v1505_v19 = vsel %vm1491_vm10, %v1304_v39, %v1297_v33  ;;  %v1132_v51 = vcombine.high %v1124_v42, %v1124_v42  ;;  %v1319_v7 = vsel %vm1234_vm8, %v1124_v42, -inf }
 0x198   : > { %v1506_v52 = vsel %vm1493_vm11, %v1311_v40, %v1505_v19  ;;  %v1248_v9 = vmax.f32 %v1246_v8, %v1247_v44  ;;  %v1255_v53 = vmax.f32 %v1253_v37, %v1254_v45  ;;  %v1261_v57 = vrot.slane %v1260_v49, 1 }
 0x199   : > { %v1133_v58 = vcombine.high %v1131_v50, %v1131_v50  ;;  %v1320_v11 = vrot.slane %v1319_v7, 4  ;;  %v1326_v43 = vsel %vm1234_vm8, %v1132_v51, -inf  ;;  %v1333_v60 = vsel %vm1234_vm8, %v1131_v50, -inf  ;;  %v2835_v48 = vpop.f32.mrb[4].mxu1 }
 0x19a   : > { %v1262_v61 = vmax.f32 %v1260_v49, %v1261_v57  ;;  %v1492_v23 = vsel %vm1491_vm10, %v1248_v9, %v1241_v36  ;;  %v1327_v62 = vrot.slane %v1326_v43, 4  ;;  %v1334_v63 = vrot.slane %v1333_v60, 4  ;;  %v1035_v0 = vpop.f32.mrb[5].mxu1 }
 0x19b   : > { %v1494_v5 = vsel %vm1493_vm11, %v1255_v53, %v1492_v23  ;;  %v1321_v18 = vmax.f32 %v1319_v7, %v1320_v11  ;;  %v1340_v12 = vsel %vm1234_vm8, %v1133_v58, -inf  ;;  %v1507_v13 = vsel %vm4230_vm12, %v1318_v2, %v1506_v52  ;;  %v2836_v3 = vpop.f32.mrb[6].mxu1 }
 0x19c   : > { %v1328_v15 = vmax.f32 %v1326_v43, %v1327_v62  ;;  %v1335_v16 = vmax.f32 %v1333_v60, %v1334_v63  ;;  %v1341_v17 = vrot.slane %v1340_v12, 4  ;;  %v1083_v20 = vcombine.high %v3728_v47, %v3728_v47  ;;  %v3759_v21 = vpop.f32.mrb[7].mxu1 }
 0x19d   : > { %v1322_v22 = vrot.slane %v1321_v18, 2  ;;  %v1090_v56 = vrot.slane %v3728_v47, %v3718_v54  ;;  %v3764_v24 = vsel %vm4230_vm12, %v1262_v61, %v1494_v5  ;;  %v1044_v25 = vadd.f32 %v2835_v48, %v3715_v10 }
 0x19e   : > { %v1329_v46 = vrot.slane %v1328_v15, 2  ;;  %v1336_v4 = vrot.slane %v1335_v16, 2  ;;  %v1342_v55 = vmax.f32 %v1340_v12, %v1341_v17  ;;  %v1097_v59 = vrot.slane %v1083_v20, %v3718_v54 }
 0x19f   : > { %v1323_v27 = vmax.f32 %v1321_v18, %v1322_v22  ;;  %v1098_v26 = vcombine.high %v1090_v56, %v1090_v56  ;;  %v1263_v28 = vsel %vm1234_vm8, %v1090_v56, -inf  ;;  %v1056_v29 = vmax.f32 %v1044_v25, 0.0 }
 0x1a0   : > { %v1330_v30 = vmax.f32 %v1328_v15, %v1329_v46  ;;  %v1337_v14 = vmax.f32 %v1335_v16, %v1336_v4  ;;  %v1343_v32 = vrot.slane %v1342_v55, 2  ;;  %v1099_v33 = vcombine.high %v1097_v59, %v1097_v59 }
 0x1a1   : > { %v1324_v47 = vrot.slane %v1323_v27, 1  ;;  %v1264_v31 = vrot.slane %v1263_v28, 4  ;;  %v1270_v34 = vsel %vm1234_vm8, %v1098_v26, -inf  ;;  %v1277_v35 = vsel %vm1234_vm8, %v1097_v59, -inf }
 0x1a2   : > { %v1331_v36 = vrot.slane %v1330_v30, 1  ;;  %v1338_v8 = vrot.slane %v1337_v14, 1  ;;  %v1344_v37 = vmax.f32 %v1342_v55, %v1343_v32  ;;  %v1271_v38 = vrot.slane %v1270_v34, 4 }
 0x1a3   : > { %v1325_v39 = vmax.f32 %v1323_v27, %v1324_v47  ;;  %v1265_v40 = vmax.f32 %v1263_v28, %v1264_v31  ;;  %v1278_v41 = vrot.slane %v1277_v35, 4  ;;  %v1284_v42 = vsel %vm1234_vm8, %v1099_v33, -inf }
 0x1a4   : > { %v1332_v44 = vmax.f32 %v1330_v30, %v1331_v36  ;;  %v1339_v45 = vmax.f32 %v1337_v14, %v1338_v8  ;;  %v1345_v49 = vrot.slane %v1344_v37, 1  ;;  %v1272_v50 = vmax.f32 %v1270_v34, %v1271_v38 }
 0x1a5   : > { %v1508_v2 = vsel %vm4231_vm13, %v1325_v39, %v1507_v13  ;;  %v1266_v19 = vrot.slane %v1265_v40, 2  ;;  %v1279_v51 = vmax.f32 %v1277_v35, %v1278_v41  ;;  %v1285_v7 = vrot.slane %v1284_v42, 4 }
 0x1a6   : > { %v3773_v52 = vmax.f32 %v1344_v37, %v1345_v49  ;;  %v1509_v9 = vsel %vm1499_vm14, %v1332_v44, %v1508_v2  ;;  %v1273_v53 = vrot.slane %v1272_v50, 2  ;;  %v1168_v57 = vcombine.high %v1056_v29, %v1056_v29 }
 0x1a7   : > { %v3777_v58 = vsel %vm1501_vm15, %v1339_v45, %v1509_v9  ;;  %v1267_v11 = vmax.f32 %v1265_v40, %v1266_v19  ;;  %v1280_v43 = vrot.slane %v1279_v51, 2  ;;  %v1286_v60 = vmax.f32 %v1284_v42, %v1285_v7 }
 0x1a8   : > { %v1274_v48 = vmax.f32 %v1272_v50, %v1273_v53  ;;  %v1175_v61 = vrot.slane %v1056_v29, %v3718_v54  ;;  %v1182_v23 = vrot.slane %v1168_v57, %v3718_v54  ;;  %v1036_v62 = vadd.f32 %v3715_v10, %v1035_v0 }
 0x1a9   : > { %v1268_v63 = vrot.slane %v1267_v11, 1  ;;  %v1281_v5 = vmax.f32 %v1279_v51, %v1280_v43  ;;  %v1287_v18 = vrot.slane %v1286_v60, 2  ;;  %v1047_v12 = vadd.f32 %v2836_v3, %v3715_v10 }
 0x1aa   : > { %v1275_v13 = vrot.slane %v1274_v48, 1  ;;  %v1183_v15 = vcombine.high %v1175_v61, %v1175_v61  ;;  %v1184_v16 = vcombine.high %v1182_v23, %v1182_v23  ;;  %v1403_v17 = vsel %vm1234_vm8, %v1175_v61, -inf }
 0x1ab   : > { %v1269_v20 = vmax.f32 %v1267_v11, %v1268_v63  ;;  %v1282_v22 = vrot.slane %v1281_v5, 1  ;;  %v1288_v56 = vmax.f32 %v1286_v60, %v1287_v18  ;;  %v1404_v25 = vrot.slane %v1403_v17, 4 }
 0x1ac   : > { %v1276_v46 = vmax.f32 %v1274_v48, %v1275_v13  ;;  %v1410_v4 = vsel %vm1234_vm8, %v1183_v15, -inf  ;;  %v1417_v55 = vsel %vm1234_vm8, %v1182_v23, -inf  ;;  %v1424_v0 = vsel %vm1234_vm8, %v1184_v16, -inf }
 0x1ad   : > { %v1283_v59 = vmax.f32 %v1281_v5, %v1282_v22  ;;  %v1289_v27 = vrot.slane %v1288_v56, 1  ;;  %v1498_v3 = vsel %vm4231_vm13, %v1269_v20, %v3764_v24  ;;  %v1405_v26 = vmax.f32 %v1403_v17, %v1404_v25 }
 0x1ae   : > { %v1500_v28 = vsel %vm1499_vm14, %v1276_v46, %v1498_v3  ;;  %v1411_v29 = vrot.slane %v1410_v4, 4  ;;  %v1418_v30 = vrot.slane %v1417_v55, 4  ;;  %v1425_v14 = vrot.slane %v1424_v0, 4 }
 0x1af   : > { %v3790_v32 = vmax.f32 %v1288_v56, %v1289_v27  ;;  %v3793_v33 = vsel %vm1501_vm15, %v1283_v59, %v1500_v28  ;;  %v1406_v47 = vrot.slane %v1405_v26, 2  ;;  %v1054_v31 = vmax.f32 %v1036_v62, 0.0 }
 0x1b0   : > { %v1412_v34 = vmax.f32 %v1410_v4, %v1411_v29  ;;  %v1419_v35 = vmax.f32 %v1417_v55, %v1418_v30  ;;  %v1426_v36 = vmax.f32 %v1424_v0, %v1425_v14  ;;  %v1057_v8 = vmax.f32 %v1047_v12, 0.0 }
 0x1b1   : > { %v1407_v37 = vmax.f32 %v1405_v26, %v1406_v47  ;;  %v1134_v38 = vcombine.high %v1054_v31, %v1054_v31  ;;  %v1141_v24 = vrot.slane %v1054_v31, %v3718_v54  ;;  %v3798_v39 = vadd.f32 %v3715_v10, %v3759_v21 }
 0x1b2   : > { %v1413_v40 = vrot.slane %v1412_v34, 2  ;;  %v1420_v41 = vrot.slane %v1419_v35, 2  ;;  %v1427_v42 = vrot.slane %v1426_v36, 2  ;;  %v1185_v44 = vcombine.high %v1057_v8, %v1057_v8 }
 0x1b3   : > { %v1408_v45 = vrot.slane %v1407_v37, 1  ;;  %v1148_v49 = vrot.slane %v1134_v38, %v3718_v54  ;;  %v1149_v50 = vcombine.high %v1141_v24, %v1141_v24  ;;  %v1347_v2 = vsel %vm1234_vm8, %v1141_v24, -inf }
 0x1b4   : > { %v1414_v19 = vmax.f32 %v1412_v34, %v1413_v40  ;;  %v1421_v51 = vmax.f32 %v1419_v35, %v1420_v41  ;;  %v1428_v7 = vmax.f32 %v1426_v36, %v1427_v42  ;;  %v1348_v9 = vrot.slane %v1347_v2, 4 }
 0x1b5   : > { %v1409_v53 = vmax.f32 %v1407_v37, %v1408_v45  ;;  %v1150_v57 = vcombine.high %v1148_v49, %v1148_v49  ;;  %v1354_v11 = vsel %vm1234_vm8, %v1149_v50, -inf  ;;  %v1361_v10 = vsel %vm1234_vm8, %v1148_v49, -inf }
 0x1b6   : > { %v1415_v21 = vrot.slane %v1414_v19, 1  ;;  %v1422_v43 = vrot.slane %v1421_v51, 1  ;;  %v1429_v60 = vrot.slane %v1428_v7, 1  ;;  %v1349_v48 = vmax.f32 %v1347_v2, %v1348_v9 }
 0x1b7   : > { %v1355_v61 = vrot.slane %v1354_v11, 4  ;;  %v1362_v23 = vrot.slane %v1361_v10, 4  ;;  %v1368_v62 = vsel %vm1234_vm8, %v1150_v57, -inf  ;;  %v1192_v63 = vrot.slane %v1057_v8, %v3718_v54 }
 0x1b8   : > { %v1416_v5 = vmax.f32 %v1414_v19, %v1415_v21  ;;  %v1423_v18 = vmax.f32 %v1421_v51, %v1422_v43  ;;  %v1430_v12 = vmax.f32 %v1428_v7, %v1429_v60  ;;  %v1350_v13 = vrot.slane %v1349_v48, 2 }
 0x1b9   : > { %v1356_v15 = vmax.f32 %v1354_v11, %v1355_v61  ;;  %v1363_v16 = vmax.f32 %v1361_v10, %v1362_v23  ;;  %v1369_v17 = vrot.slane %v1368_v62, 4  ;;  %v1199_v20 = vrot.slane %v1185_v44, %v3718_v54 }
 0x1ba   : > { %v1519_v22 = vsel %vm1491_vm10, %v1416_v5, %v1409_v53  ;;  %v1351_v56 = vmax.f32 %v1349_v48, %v1350_v13  ;;  %v1200_v25 = vcombine.high %v1192_v63, %v1192_v63  ;;  %v1431_v46 = vsel %vm1234_vm8, %v1192_v63, -inf }
 0x1bb   : > { %v1520_v4 = vsel %vm1493_vm11, %v1423_v18, %v1519_v22  ;;  %v1357_v55 = vrot.slane %v1356_v15, 2  ;;  %v1364_v0 = vrot.slane %v1363_v16, 2  ;;  %v1370_v59 = vmax.f32 %v1368_v62, %v1369_v17 }
 0x1bc   : > { %v1352_v27 = vrot.slane %v1351_v56, 1  ;;  %v1201_v3 = vcombine.high %v1199_v20, %v1199_v20  ;;  %v1432_v26 = vrot.slane %v1431_v46, 4  ;;  %v1438_v28 = vsel %vm1234_vm8, %v1200_v25, -inf }
 0x1bd   : > { %v1358_v29 = vmax.f32 %v1356_v15, %v1357_v55  ;;  %v1365_v30 = vmax.f32 %v1363_v16, %v1364_v0  ;;  %v1371_v14 = vrot.slane %v1370_v59, 2  ;;  %v1439_v47 = vrot.slane %v1438_v28, 4 }
 0x1be   : > { %v1353_v31 = vmax.f32 %v1351_v56, %v1352_v27  ;;  %v1433_v34 = vmax.f32 %v1431_v46, %v1432_v26  ;;  %v1445_v35 = vsel %vm1234_vm8, %v1199_v20, -inf  ;;  %v1452_v36 = vsel %vm1234_vm8, %v1201_v3, -inf }
 0x1bf   : > { %v1359_v8 = vrot.slane %v1358_v29, 1  ;;  %v1366_v37 = vrot.slane %v1365_v30, 1  ;;  %v1372_v38 = vmax.f32 %v1370_v59, %v1371_v14  ;;  %v1440_v24 = vmax.f32 %v1438_v28, %v1439_v47 }
 0x1c0   : > { %v1434_v40 = vrot.slane %v1433_v34, 2  ;;  %v1446_v41 = vrot.slane %v1445_v35, 4  ;;  %v1453_v42 = vrot.slane %v1452_v36, 4  ;;  %v1521_v44 = vsel %vm4230_vm12, %v1430_v12, %v1520_v4 }
 0x1c1   : > { %v1360_v45 = vmax.f32 %v1358_v29, %v1359_v8  ;;  %v1367_v49 = vmax.f32 %v1365_v30, %v1366_v37  ;;  %v1373_v50 = vrot.slane %v1372_v38, 1  ;;  %v1441_v2 = vrot.slane %v1440_v24, 2 }
 0x1c2   : > { %v1435_v19 = vmax.f32 %v1433_v34, %v1434_v40  ;;  %v1447_v51 = vmax.f32 %v1445_v35, %v1446_v41  ;;  %v1454_v7 = vmax.f32 %v1452_v36, %v1453_v42  ;;  %v1055_v9 = vmax.f32 %v3798_v39, 0.0 }
 0x1c3   : > { %v1374_v53 = vmax.f32 %v1372_v38, %v1373_v50  ;;  %v1512_v57 = vsel %vm1491_vm10, %v1360_v45, %v1353_v31  ;;  %v1442_v11 = vmax.f32 %v1440_v24, %v1441_v2  ;;  %v3819_v10 = vsel %vm1503_vm6, %v3790_v32, %v3793_v33 }
 0x1c4   : > { %v1513_v21 = vsel %vm1493_vm11, %v1367_v49, %v1512_v57  ;;  %v1436_v43 = vrot.slane %v1435_v19, 1  ;;  %v1448_v60 = vrot.slane %v1447_v51, 2  ;;  %v1455_v48 = vrot.slane %v1454_v7, 2 }
 0x1c5   : > { %v1443_v61 = vrot.slane %v1442_v11, 1  ;;  %v1151_v23 = vcombine.high %v1055_v9, %v1055_v9  ;;  %v1158_v62 = vrot.slane %v1055_v9, %v3718_v54  ;;  %v3824_v39 = vsel %vm4230_vm12, %v1374_v53, %v1513_v21 }
 0x1c6   : > { %v1437_v63 = vmax.f32 %v1435_v19, %v1436_v43  ;;  %v1449_v5 = vmax.f32 %v1447_v51, %v1448_v60  ;;  %v1456_v18 = vmax.f32 %v1454_v7, %v1455_v48  ;;  %v3829_v32 = vsel %vm1503_vm6, %v3773_v52, %v3777_v58 }
 0x1c7   : > { %v1444_v33 = vmax.f32 %v1442_v11, %v1443_v61  ;;  %v1165_v12 = vrot.slane %v1151_v23, %v3718_v54  ;;  %v1166_v13 = vcombine.high %v1158_v62, %v1158_v62  ;;  %v1375_v15 = vsel %vm1234_vm8, %v1158_v62, -inf }
 0x1c8   : > { %v1450_v16 = vrot.slane %v1449_v5, 1  ;;  %v1457_v17 = vrot.slane %v1456_v18, 1  ;;  %v1522_v20 = vsel %vm4231_vm13, %v1437_v63, %v1521_v44  ;;  %v1376_v22 = vrot.slane %v1375_v15, 4 }
 0x1c9   : > { %v1523_v56 = vsel %vm1499_vm14, %v1444_v33, %v1522_v20  ;;  %v1167_v25 = vcombine.high %v1165_v12, %v1165_v12  ;;  %v1382_v46 = vsel %vm1234_vm8, %v1166_v13, -inf  ;;  %v1389_v4 = vsel %vm1234_vm8, %v1165_v12, -inf }
 0x1ca   : > { %v1451_v52 = vmax.f32 %v1449_v5, %v1450_v16  ;;  %v1458_v58 = vmax.f32 %v1456_v18, %v1457_v17  ;;  %v1377_v55 = vmax.f32 %v1375_v15, %v1376_v22  ;;  %v1383_v0 = vrot.slane %v1382_v46, 4 }
 0x1cb   : > { %v1390_v59 = vrot.slane %v1389_v4, 4  ;;  %v1396_v27 = vsel %vm1234_vm8, %v1167_v25, -inf  ;;  %v3069_v3 = vpack.i.bf16 %v3829_v32, %v3819_v10  ;;  %v1550_v26 = vrot.slane %v3819_v10, 6 }
 0x1cc   : > { %v1524_v28 = vsel %vm1501_vm15, %v1451_v52, %v1523_v56  ;;  %v1378_v29 = vrot.slane %v1377_v55, 2  ;;  %v1384_v30 = vmax.f32 %v1382_v46, %v1383_v0  ;;  %v1397_v14 = vrot.slane %v1396_v27, 4 }
 0x1cd   : > { %v1391_v47 = vmax.f32 %v1389_v4, %v1390_v59  ;;  %3070 = vrot.lane.b32.xlu0 %v3069_v3, %s3227_s23  ;;  %v3844_v31 = vsel %vm1503_vm6, %v1458_v58, %v1524_v28  ;;  %v1551_v34 = vrot.slane %v3829_v32, 6  ;;  %v1570_v35 = vrot.slane %v3819_v10, 7  ;;  %v3139_v58 = vld [vmem:[%s4248_s3] sm:$0xff]  }
 0x1ce   : > { %v1379_v36 = vmax.f32 %v1377_v55, %v1378_v29  ;;  %v1385_v8 = vrot.slane %v1384_v30, 2  ;;  %v1398_v37 = vmax.f32 %v1396_v27, %v1397_v14  ;;  %v1553_v38 = vrot.slane %v3844_v31, 6  ;;  %2837 = vmatprep.subr.bf16.mxu1 %v3139_v58 }
 0x1cf   : > { %v1392_v24 = vrot.slane %v1391_v47, 2  ;;  %v1556_v40 = vsel %vm552_vm1, %v1550_v26, %v1551_v34  ;;  %v1571_v41 = vrot.slane %v3829_v32, 7  ;;  %v1573_v42 = vrot.slane %v3844_v31, 7  ;;  %2838 = vmatpush3.bf16.msra.mxu1 %v3139_v58 }
 0x1d0   : > { %vm1625_vm12 = vcmp.ge.s32.totalorder %v3731_v6, 30  ;;  %v1380_v44 = vrot.slane %v1379_v36, 1  ;;  %v1386_v45 = vmax.f32 %v1384_v30, %v1385_v8  ;;  %v1399_v49 = vrot.slane %v1398_v37, 2 }
 0x1d1   : > { %v1557_v50 = vsel %vm552_vm1, %v1553_v38, %v1550_v26  ;;  %v1393_v2 = vmax.f32 %v1391_v47, %v1392_v24  ;;  %v1576_v51 = vsel %vm584_vm0, %v1570_v35, %v1571_v41  ;;  %v1577_v7 = vsel %vm584_vm0, %v1573_v42, %v1570_v35 }
 0x1d2   : > { %v1566_v19 = vsel %vm552_vm1, 0.0, %v1557_v50  ;;  %v1381_v9 = vmax.f32 %v1379_v36, %v1380_v44  ;;  %v1387_v53 = vrot.slane %v1386_v45, 1  ;;  %v1400_v57 = vmax.f32 %v1398_v37, %v1399_v49 }
 0x1d3   : > { %v3079_v11 = vpack.i.bf16 %v1556_v40, %v1566_v19  ;;  %v1394_v21 = vrot.slane %v1393_v2, 1  ;;  %v1586_v43 = vsel %vm584_vm0, 0.0, %v1577_v7  ;;  %v1590_v60 = vrot.slane %v3819_v10, 1 }
 0x1d4   : > { %v1591_v48 = vrot.slane %v3829_v32, 1  ;;  %v1388_v61 = vmax.f32 %v1386_v45, %v1387_v53  ;;  %v1401_v23 = vrot.slane %v1400_v57, 1  ;;  %v1515_v62 = vsel %vm4231_vm13, %v1381_v9, %v3824_v39 }
 0x1d5   : > { %3080 = vrot.lane.b32.xlu0 %v3079_v11, %s4232_s25  ;;  %v3089_v63 = vpack.i.bf16 %v1576_v51, %v1586_v43  ;;  %v1395_v5 = vmax.f32 %v1393_v2, %v1394_v21  ;;  %v1593_v33 = vrot.slane %v3844_v31, 1  ;;  %v1614_v12 = vrot.slane %v3819_v10, 2  ;;  %v3141_v11 = vld [vmem:[%s4248_s3 + $0x10] sm:$0xff]  }
 0x1d6   : > { %v1596_v18 = vsel %vm616_vm2, %v1590_v60, %v1591_v48  ;;  %v1402_v13 = vmax.f32 %v1400_v57, %v1401_v23  ;;  %v1516_v15 = vsel %vm1499_vm14, %v1388_v61, %v1515_v62  ;;  %v1615_v16 = vrot.slane %v3829_v32, 2 }
 0x1d7   : > { %v1617_v17 = vrot.slane %v3844_v31, 2  ;;  %vm1649_vm13 = vcmp.ge.s32.totalorder %v3731_v6, 29  ;;  %v1517_v39 = vsel %vm1501_vm15, %v1395_v5, %v1516_v15  ;;  %v1597_v20 = vsel %vm616_vm2, %v1593_v33, %v1590_v60 }
 0x1d8   : > { %v1638_v22 = vrot.slane %v3819_v10, 3  ;;  %v1639_v56 = vrot.slane %v3829_v32, 3  ;;  %v1518_v25 = vsel %vm1503_vm6, %v1402_v13, %v1517_v39  ;;  %v1613_v46 = vsel %vm1601_vm7, 0.0, %v1597_v20 }
 0x1d9   : > { %3090 = vrot.lane.b32.xlu0 %v3089_v63, %s4236_s16  ;;  %v1620_v4 = vsel %vm649_vm3, %v1614_v12, %v1615_v16  ;;  %v1621_v52 = vsel %vm649_vm3, %v1617_v17, %v1614_v12  ;;  %v3074_v55 = vpack.i.bf16 %v3844_v31, %v1518_v25  ;;  %v1552_v0 = vrot.slane %v1518_v25, 6 }
 0x1da   : > { %v1572_v59 = vrot.slane %v1518_v25, 7  ;;  %v1592_v27 = vrot.slane %v1518_v25, 1  ;;  %v1616_v3 = vrot.slane %v1518_v25, 2  ;;  %v1637_v26 = vsel %vm1625_vm12, 0.0, %v1621_v52 }
 0x1db   : > { %v1640_v28 = vrot.slane %v1518_v25, 3  ;;  %v1644_v29 = vsel %vm682_vm4, %v1638_v22, %v1639_v56  ;;  %3075 = vrot.lane.b32.xlu1 %v3074_v55, %s3227_s23  ;;  %v1554_v30 = vsel %vm552_vm1, %v1552_v0, %v1553_v38  ;;  %v1555_v14 = vsel %vm552_vm1, %v1551_v34, %v1552_v0  ;;  %v3140_v38 = vld [vmem:[%s4248_s3 + $0x8] sm:$0xff]   ;;  %s3231_s23 = smov 40  }
 0x1dc   : > { %v1574_v47 = vsel %vm584_vm0, %v1572_v59, %v1573_v42  ;;  %v1575_v35 = vsel %vm584_vm0, %v1571_v41, %v1572_v59  ;;  %v3084_v36 = vpack.i.bf16 %v1554_v30, %v1555_v14  ;;  %v1595_v37 = vsel %vm616_vm2, %v1591_v48, %v1592_v27  ;;  %2839 = vmatprep.subr.bf16.mxu1 %v3140_v38 }
 0x1dd   : > { %v3094_v8 = vpack.i.bf16 %v1574_v47, %v1575_v35  ;;  %v1594_v24 = vsel %vm616_vm2, %v1592_v27, %v1593_v33  ;;  %v3099_v34 = vpack.i.bf16 %v1595_v37, %v1596_v18  ;;  %v1619_v42 = vsel %vm649_vm3, %v1615_v16, %v1616_v3  ;;  %2840 = vmatpush3.bf16.msra.mxu1 %v3140_v38 }
 0x1de   : > { %v3104_v40 = vpack.i.bf16 %v1613_v46, %v1594_v24  ;;  %v1618_v41 = vsel %vm649_vm3, %v1616_v3, %v1617_v17  ;;  %v3109_v44 = vpack.i.bf16 %v1619_v42, %v1620_v4  ;;  %v1643_v49 = vsel %vm682_vm4, %v1639_v56, %v1640_v28  ;;  %2841 = vmatprep.subr.bf16.mxu1 %v3141_v11 }
 0x1df   : > { %v3114_v45 = vpack.i.bf16 %v1637_v26, %v1618_v41  ;;  %v1641_v50 = vrot.slane %v3844_v31, 3  ;;  %3085 = vrot.lane.b32.xlu1 %v3084_v36, %s4232_s25  ;;  %3100 = vrot.lane.b32.xlu0 %v3099_v34, %s4234_s26  ;;  %v3119_v2 = vpack.i.bf16 %v1643_v49, %v1644_v29  ;;  %v1531_v19 = vrot.slane %v3829_v32, 5  ;;  %s4233_s25 = smov 48  }
 0x1e0   : > { %v1533_v51 = vrot.slane %v3844_v31, 5  ;;  %v1530_v53 = vrot.slane %v3819_v10, 5  ;;  %v1532_v57 = vrot.slane %v1518_v25, 5  ;;  %v3142_v10 = vld [vmem:[%s4248_s3 + $0x18] ss:$0 sps:$4 sm:$0xff]   ;;  %vm1754_vm1 = vcmask 64512  }
 0x1e1   : > { %v1642_v7 = vsel %vm682_vm4, %v1640_v28, %v1641_v50  ;;  %v1645_v9 = vsel %vm682_vm4, %v1641_v50, %v1638_v22  ;;  %2842 = vmatpush3.bf16.msra.mxu1 %v3141_v11  ;;  %v1829_v48 = vsel %vm979_vm9, %v3142_v10, 0  ;;  %vm1759_vm3 = vcmask 130048   ;;  %s3159_s3 = sshll.u32 %s3235_s1, 4  ;;  %s3160_s3 = int_to_ptr.vmem [resolvable:$false] %s3159_s3 }
 0x1e2   : > { %v1661_v21 = vsel %vm1649_vm13, 0.0, %v1645_v9  ;;  %v1536_v31 = vsel %vm520_vm5, %v1530_v53, %v1531_v19  ;;  %v1537_v43 = vsel %vm520_vm5, %v1533_v51, %v1530_v53  ;;  %v3946_v60 = vsel %vm520_vm5, %v1532_v57, %v1533_v51  ;;  %2893 = vmatprep.subr.msk.bf16.mxu1 %vm979_vm9, %v3142_v10 }
 0x1e3   : > { %v3124_v32 = vpack.i.bf16 %v1661_v21, %v1642_v7  ;;  %3095 = vrot.lane.b32.xlu1 %v3094_v8, %s4236_s16  ;;  %3110 = vrot.lane.b32.xlu0 %v3109_v44, %s3231_s23  ;;  %v1535_v6 = vsel %vm520_vm5, %v1531_v19, %v1532_v57  ;;  %v1546_v16 = vsel %vm520_vm5, 0.0, %v1537_v43  ;;  %vm1764_vm4 = vcmask 195584  }
 0x1e4   : > { %vm1769_vm12 = vcmask 261120   ;;  %vm1774_vm5 = vcmask 326656   ;;  %vm1779_vm13 = vcmask 392192   ;;  %vm1821_vm7 = vcmask 457728  }
 0x1e5   : > { %2844 = vmatpush3.bf16.msra.mxu1 %v1829_v48 }
 0x1e7   : > { %3105 = vrot.lane.b32.xlu1 %v3104_v40, %s4234_s26  ;;  %3120 = vrot.lane.b32.xlu0 %v3119_v2, %s4233_s25  ;;  %s4256_s26 = smov 16  }
 0x1eb   : > { %3115 = vrot.lane.b32.xlu1 %v3114_v45, %s3231_s23  ;;  %s4253_s23 = smov 8  }
 0x1ef   : > { %3125 = vrot.lane.b32.xlu1 %v3124_v32, %s4233_s25 }
 0x23f   : > { %v3071_v61 = vpop.permute.xlu0 %3070 }
 0x240   : > { %v3073_v52 = vunpack.i.h.bf16 %v3071_v61  ;;  %v3072_v58 = vunpack.i.l.bf16 %v3071_v61 }
 0x247   : > { %v3081_v23 = vpop.permute.xlu0 %3080 }
 0x248   : > { %v3083_v5 = vunpack.i.h.bf16 %v3081_v23  ;;  %v3082_v18 = vunpack.i.l.bf16 %v3081_v23  ;;  %v2770_v23 = vld [vmem:[%s4216_s4] ss:$0 sm:$0xff] }
 0x24a   : > { %v1755_v17 = vsel %vm1754_vm1, %v1546_v16, %v3082_v18  ;;  %v1756_v39 = vsel %vm1754_vm1, %v1536_v31, %v3083_v5 }
 0x24b   : > { %v3091_v62 = vpop.permute.xlu0 %3090 }
 0x24c   : > { %v3093_v12 = vunpack.i.h.bf16 %v3091_v62  ;;  %v3092_v13 = vunpack.i.l.bf16 %v3091_v62 }
 0x24d   : > { %v3076_v63 = vpop.permute.xlu1 %3075 }
 0x24e   : > { %v1760_v20 = vsel %vm1759_vm3, %v1755_v17, %v3092_v13  ;;  %v1761_v22 = vsel %vm1759_vm3, %v1756_v39, %v3093_v12  ;;  %v3078_v19 = vunpack.i.h.bf16 %v3076_v63  ;;  %v3077_v51 = vunpack.i.l.bf16 %v3076_v63 }
 0x24f   : > { %v1765_v59 = vsel %vm1764_vm4, %v1760_v20, %v3072_v58  ;;  %v1766_v27 = vsel %vm1764_vm4, %v1761_v22, %v3073_v52 }
 0x251   : > { %v3086_v33 = vpop.permute.xlu1 %3085  ;;  %v3101_v15 = vpop.permute.xlu0 %3100 }
 0x252   : > { %v3103_v25 = vunpack.i.h.bf16 %v3101_v15  ;;  %v3102_v46 = vunpack.i.l.bf16 %v3101_v15  ;;  %v3088_v3 = vunpack.i.h.bf16 %v3086_v33  ;;  %v3087_v26 = vunpack.i.l.bf16 %v3086_v33 }
 0x254   : > { %v1770_v28 = vsel %vm1769_vm12, %v1765_v59, %v3102_v46  ;;  %v1771_v29 = vsel %vm1769_vm12, %v1766_v27, %v3103_v25  ;;  %v1757_v40 = vsel %vm1754_vm1, %v1535_v6, %v3087_v26  ;;  %v1758_v42 = vsel %vm1754_vm1, %v3946_v60, %v3088_v3 }
 0x255   : > { %v3096_v56 = vpop.permute.xlu1 %3095  ;;  %v3111_v4 = vpop.permute.xlu0 %3110 }
 0x256   : > { %v3113_v55 = vunpack.i.h.bf16 %v3111_v4  ;;  %v3112_v0 = vunpack.i.l.bf16 %v3111_v4  ;;  %v3098_v47 = vunpack.i.h.bf16 %v3096_v56  ;;  %v3097_v35 = vunpack.i.l.bf16 %v3096_v56 }
 0x258   : > { %v1775_v37 = vsel %vm1774_vm5, %v1770_v28, %v3112_v0  ;;  %v1776_v24 = vsel %vm1774_vm5, %v1771_v29, %v3113_v55  ;;  %v1762_v45 = vsel %vm1759_vm3, %v1757_v40, %v3097_v35  ;;  %v1763_v49 = vsel %vm1759_vm3, %v1758_v42, %v3098_v47 }
 0x259   : > { %v3106_v30 = vpop.permute.xlu1 %3105  ;;  %v3121_v14 = vpop.permute.xlu0 %3120  ;;  %v1767_v53 = vsel %vm1764_vm4, %v1762_v45, %v3077_v51  ;;  %v1768_v57 = vsel %vm1764_vm4, %v1763_v49, %v3078_v19 }
 0x25a   : > { %v3123_v36 = vunpack.i.h.bf16 %v3121_v14  ;;  %v3122_v8 = vunpack.i.l.bf16 %v3121_v14  ;;  %v3108_v50 = vunpack.i.h.bf16 %v3106_v30  ;;  %v3107_v2 = vunpack.i.l.bf16 %v3106_v30 }
 0x25c   : > { %v1780_v38 = vsel %vm1779_vm13, %v1775_v37, %v3122_v8  ;;  %v1781_v34 = vsel %vm1779_vm13, %v1776_v24, %v3123_v36  ;;  %v1773_v21 = vsel %vm1769_vm12, %v1768_v57, %v3108_v50  ;;  %v1772_v32 = vsel %vm1769_vm12, %v1767_v53, %v3107_v2 }
 0x25d   : > { %v3116_v41 = vpop.permute.xlu1 %3115  ;;  %v1784_v44 = vpack.c.bf16 %v1781_v34, %v1780_v38 }
 0x25e   : > { %v3118_v7 = vunpack.i.h.bf16 %v3116_v41  ;;  %v3117_v9 = vunpack.i.l.bf16 %v3116_v41 }
 0x25f   : > { %2845 = vmatprep.mubr.msk.bf16.mxu1 %vm1821_vm7, %v1784_v44 }
 0x260   : > { %v1777_v60 = vsel %vm1774_vm5, %v1772_v32, %v3117_v9  ;;  %v1778_v6 = vsel %vm1774_vm5, %v1773_v21, %v3118_v7  ;;  %vm4249_vm5 = vcmask 1043459  }
 0x261   : > { %v3126_v11 = vpop.permute.xlu1 %3125 }
 0x262   : > { %v3128_v31 = vunpack.i.h.bf16 %v3126_v11  ;;  %v3127_v43 = vunpack.i.l.bf16 %v3126_v11 }
 0x264   : > { %v1782_v10 = vsel %vm1779_vm13, %v1777_v60, %v3127_v43  ;;  %v1783_v48 = vsel %vm1779_vm13, %v1778_v6, %v3128_v31 }
 0x265   : > { %v1785_v61 = vpack.c.bf16 %v1783_v48, %v1782_v10 }
 0x267   : > { %2846 = vmatmul.mubr.msk.bf16.vlgmr.msra.gmra.mrb[8].mxu1 %vm1821_vm7, %v1785_v61  ;;  %vm4250_vm7 = vcmask 1044484  }
 0x33a   : > { %v2847_v62 = vpop.f32.mrb[8].mxu1 }
 0x33b   : > { %v1874_v63 = vadd.f32 %v2847_v62, %v2770_v23  ;;  %v1865_v5 = vpop.f32.mrb[9].mxu1 }
 0x33c   : > { %v1866_v18 = vadd.f32 %v2770_v23, %v1865_v5  ;;  %v2848_v33 = vpop.f32.mrb[10].mxu1 }
 0x33d   : > { %v1882_v12 = vmax.f32 %v1874_v63, 0.0  ;;  %v1877_v13 = vadd.f32 %v2848_v33, %v2770_v23  ;;  %v1868_v15 = vpop.f32.mrb[11].mxu1 }
 0x33e   : > { %v1880_v16 = vmax.f32 %v1866_v18, 0.0  ;;  %v3993_v56 = vadd.f32 %v2770_v23, %v1868_v15 }
 0x33f   : > { %v1922_v17 = vcombine.high %v1882_v12, %v1882_v12  ;;  %v1929_v39 = vrot.slane %v1882_v12, %v3718_v54  ;;  %v1883_v52 = vmax.f32 %v1877_v13, 0.0 }
 0x340   : > { %v1888_v20 = vcombine.high %v1880_v16, %v1880_v16  ;;  %v1895_v22 = vrot.slane %v1880_v16, %v3718_v54 }
 0x341   : > { %v1936_v25 = vrot.slane %v1922_v17, %v3718_v54  ;;  %v1937_v46 = vcombine.high %v1929_v39, %v1929_v39  ;;  %v2028_v4 = vsel %vm1234_vm8, %v1929_v39, -inf  ;;  %v1939_v6 = vcombine.high %v1883_v52, %v1883_v52 }
 0x342   : > { %v2029_v58 = vrot.slane %v2028_v4, 4  ;;  %v1902_v55 = vrot.slane %v1888_v20, %v3718_v54  ;;  %v1903_v0 = vcombine.high %v1895_v22, %v1895_v22  ;;  %v1972_v59 = vsel %vm1234_vm8, %v1895_v22, -inf }
 0x343   : > { %v1938_v27 = vcombine.high %v1936_v25, %v1936_v25  ;;  %v2035_v3 = vsel %vm1234_vm8, %v1937_v46, -inf  ;;  %v2042_v26 = vsel %vm1234_vm8, %v1936_v25, -inf  ;;  %v1973_v28 = vrot.slane %v1972_v59, 4 }
 0x344   : > { %v2030_v29 = vmax.f32 %v2028_v4, %v2029_v58  ;;  %v2036_v30 = vrot.slane %v2035_v3, 4  ;;  %v2043_v14 = vrot.slane %v2042_v26, 4  ;;  %v1904_v47 = vcombine.high %v1902_v55, %v1902_v55 }
 0x345   : > { %v2049_v35 = vsel %vm1234_vm8, %v1938_v27, -inf  ;;  %v1974_v36 = vmax.f32 %v1972_v59, %v1973_v28  ;;  %v1979_v8 = vsel %vm1234_vm8, %v1903_v0, -inf  ;;  %v1986_v37 = vsel %vm1234_vm8, %v1902_v55, -inf }
 0x346   : > { %v2031_v24 = vrot.slane %v2030_v29, 2  ;;  %v2037_v38 = vmax.f32 %v2035_v3, %v2036_v30  ;;  %v2044_v34 = vmax.f32 %v2042_v26, %v2043_v14  ;;  %v2050_v40 = vrot.slane %v2049_v35, 4 }
 0x347   : > { %v1975_v42 = vrot.slane %v1974_v36, 2  ;;  %v1980_v41 = vrot.slane %v1979_v8, 4  ;;  %v1987_v44 = vrot.slane %v1986_v37, 4  ;;  %v1993_v45 = vsel %vm1234_vm8, %v1904_v47, -inf }
 0x348   : > { %v2032_v49 = vmax.f32 %v2030_v29, %v2031_v24  ;;  %v2038_v50 = vrot.slane %v2037_v38, 2  ;;  %v2045_v2 = vrot.slane %v2044_v34, 2  ;;  %v2051_v19 = vmax.f32 %v2049_v35, %v2050_v40 }
 0x349   : > { %v1976_v51 = vmax.f32 %v1974_v36, %v1975_v42  ;;  %v1981_v7 = vmax.f32 %v1979_v8, %v1980_v41  ;;  %v1988_v9 = vmax.f32 %v1986_v37, %v1987_v44  ;;  %v1994_v53 = vrot.slane %v1993_v45, 4 }
 0x34a   : > { %v2033_v57 = vrot.slane %v2032_v49, 1  ;;  %v2039_v11 = vmax.f32 %v2037_v38, %v2038_v50  ;;  %v2046_v21 = vmax.f32 %v2044_v34, %v2045_v2  ;;  %v2052_v32 = vrot.slane %v2051_v19, 2 }
 0x34b   : > { %v1982_v31 = vrot.slane %v1981_v7, 2  ;;  %v1989_v43 = vrot.slane %v1988_v9, 2  ;;  %v1995_v60 = vmax.f32 %v1993_v45, %v1994_v53  ;;  %v1977_v23 = vrot.slane %v1976_v51, 1 }
 0x34c   : > { %v2040_v10 = vrot.slane %v2039_v11, 1  ;;  %v2047_v48 = vrot.slane %v2046_v21, 1  ;;  %v2053_v61 = vmax.f32 %v2051_v19, %v2052_v32  ;;  %v2034_v62 = vmax.f32 %v2032_v49, %v2033_v57 }
 0x34d   : > { %v1983_v63 = vmax.f32 %v1981_v7, %v1982_v31  ;;  %v1990_v5 = vmax.f32 %v1988_v9, %v1989_v43  ;;  %v1996_v18 = vrot.slane %v1995_v60, 2  ;;  %v1946_v15 = vrot.slane %v1883_v52, %v3718_v54 }
 0x34e   : > { %v2041_v33 = vmax.f32 %v2039_v11, %v2040_v10  ;;  %v2048_v12 = vmax.f32 %v2046_v21, %v2047_v48  ;;  %v2054_v13 = vrot.slane %v2053_v61, 1  ;;  %v1953_v20 = vrot.slane %v1939_v6, %v3718_v54 }
 0x34f   : > { %v1984_v16 = vrot.slane %v1983_v63, 1  ;;  %v1991_v17 = vrot.slane %v1990_v5, 1  ;;  %v1997_v39 = vmax.f32 %v1995_v60, %v1996_v18  ;;  %v1954_v25 = vcombine.high %v1946_v15, %v1946_v15 }
 0x350   : > { %v2107_v22 = vsel %vm1491_vm10, %v2041_v33, %v2034_v62  ;;  %v2056_v46 = vsel %vm1234_vm8, %v1946_v15, -inf  ;;  %v1881_v4 = vmax.f32 %v3993_v56, 0.0  ;;  %v2055_v58 = vmax.f32 %v2053_v61, %v2054_v13 }
 0x351   : > { %v1978_v55 = vmax.f32 %v1976_v51, %v1977_v23  ;;  %v1985_v0 = vmax.f32 %v1983_v63, %v1984_v16  ;;  %v1998_v59 = vrot.slane %v1997_v39, 1  ;;  %v1955_v27 = vcombine.high %v1953_v20, %v1953_v20 }
 0x352   : > { %v2057_v3 = vrot.slane %v2056_v46, 4  ;;  %v2063_v52 = vsel %vm1234_vm8, %v1954_v25, -inf  ;;  %v2070_v26 = vsel %vm1234_vm8, %v1953_v20, -inf  ;;  %v2108_v28 = vsel %vm1493_vm11, %v2048_v12, %v2107_v22 }
 0x353   : > { %v1992_v29 = vmax.f32 %v1990_v5, %v1991_v17  ;;  %v2064_v30 = vrot.slane %v2063_v52, 4  ;;  %v2071_v14 = vrot.slane %v2070_v26, 4  ;;  %v1999_v47 = vmax.f32 %v1997_v39, %v1998_v59 }
 0x354   : > { %v2058_v35 = vmax.f32 %v2056_v46, %v2057_v3  ;;  %v2077_v36 = vsel %vm1234_vm8, %v1955_v27, -inf  ;;  %v1905_v56 = vcombine.high %v1881_v4, %v1881_v4  ;;  %v1912_v38 = vrot.slane %v1881_v4, %v3718_v54 }
 0x355   : > { %v2065_v8 = vmax.f32 %v2063_v52, %v2064_v30  ;;  %v2072_v37 = vmax.f32 %v2070_v26, %v2071_v14  ;;  %v2078_v24 = vrot.slane %v2077_v36, 4  ;;  %v2100_v34 = vsel %vm1491_vm10, %v1985_v0, %v1978_v55  ;;  %v3143_v26 = vld [vmem:[%s4217_s5] sm:$0xff]  }
 0x356   : > { %v2059_v40 = vrot.slane %v2058_v35, 2  ;;  %v1919_v42 = vrot.slane %v1905_v56, %v3718_v54  ;;  %v2109_v41 = vsel %vm4249_vm5, %v2055_v58, %v2108_v28  ;;  %v1920_v50 = vcombine.high %v1912_v38, %v1912_v38 }
 0x357   : > { %v2066_v44 = vrot.slane %v2065_v8, 2  ;;  %v2073_v45 = vrot.slane %v2072_v37, 2  ;;  %v2079_v49 = vmax.f32 %v2077_v36, %v2078_v24  ;;  %v2000_v51 = vsel %vm1234_vm8, %v1912_v38, -inf }
 0x358   : > { %v2060_v2 = vmax.f32 %v2058_v35, %v2059_v40  ;;  %v1921_v19 = vcombine.high %v1919_v42, %v1919_v42  ;;  %v2014_v7 = vsel %vm1234_vm8, %v1919_v42, -inf  ;;  %v2001_v11 = vrot.slane %v2000_v51, 4 }
 0x359   : > { %v2067_v9 = vmax.f32 %v2065_v8, %v2066_v44  ;;  %v2074_v53 = vmax.f32 %v2072_v37, %v2073_v45  ;;  %v2080_v57 = vrot.slane %v2079_v49, 2  ;;  %v2007_v32 = vsel %vm1234_vm8, %v1920_v50, -inf  ;;  %v3144_v37 = vld [vmem:[%s4217_s5 + $0x8] ss:$0 sps:$4 sm:$0xff]  }
 0x35a   : > { %v2061_v21 = vrot.slane %v2060_v2, 1  ;;  %v2015_v31 = vrot.slane %v2014_v7, 4  ;;  %v2021_v43 = vsel %vm1234_vm8, %v1921_v19, -inf  ;;  %v2002_v48 = vmax.f32 %v2000_v51, %v2001_v11  ;;  %vm4251_vm8 = vmmov %vm4249_vm5 }
 0x35b   : > { %v2068_v60 = vrot.slane %v2067_v9, 1  ;;  %v2075_v6 = vrot.slane %v2074_v53, 1  ;;  %v2081_v10 = vmax.f32 %v2079_v49, %v2080_v57  ;;  %v2008_v23 = vrot.slane %v2007_v32, 4  ;;  %vm4252_vm5 = vmmov %vm4250_vm7 }
 0x35c   : > { %v2062_v61 = vmax.f32 %v2060_v2, %v2061_v21  ;;  %v2016_v62 = vmax.f32 %v2014_v7, %v2015_v31  ;;  %v2022_v63 = vrot.slane %v2021_v43, 4  ;;  %v2003_v33 = vrot.slane %v2002_v48, 2 }
 0x35d   : > { %v2069_v5 = vmax.f32 %v2067_v9, %v2068_v60  ;;  %v2076_v18 = vmax.f32 %v2074_v53, %v2075_v6  ;;  %v2082_v12 = vrot.slane %v2081_v10, 1  ;;  %v2009_v13 = vmax.f32 %v2007_v32, %v2008_v23 }
 0x35e   : > { %v2017_v15 = vrot.slane %v2016_v62, 2  ;;  %v2023_v16 = vmax.f32 %v2021_v43, %v2022_v63  ;;  %v2110_v17 = vsel %vm4250_vm7, %v2062_v61, %v2109_v41  ;;  %v2101_v39 = vsel %vm1493_vm11, %v1992_v29, %v2100_v34  ;;  %v3146_v63 = vld [vmem:[%s4219_s7 + $0x8] sm:$0xff]  }
 0x35f   : > { %v2004_v20 = vmax.f32 %v2002_v48, %v2003_v33  ;;  %v2083_v22 = vmax.f32 %v2081_v10, %v2082_v12  ;;  %v2111_v25 = vsel %vm1499_vm14, %v2069_v5, %v2110_v17  ;;  %v2010_v46 = vrot.slane %v2009_v13, 2  ;;  %v2777_v5 = vld [vmem:[%s4218_s6] ss:$0 sm:$0xff] }
 0x360   : > { %v2018_v4 = vmax.f32 %v2016_v62, %v2017_v15  ;;  %v2024_v58 = vrot.slane %v2023_v16, 2  ;;  %v2112_v55 = vsel %vm1501_vm15, %v2076_v18, %v2111_v25  ;;  %v2102_v52 = vsel %vm4251_vm8, %v1999_v47, %v2101_v39  ;;  %v3145_v62 = vld [vmem:[%s4219_s7] sm:$0xff]  }
 0x361   : > { %v2005_v0 = vrot.slane %v2004_v20, 1  ;;  %v2113_v59 = vsel %vm1503_vm6, %v2083_v22, %v2112_v55  ;;  %v2011_v27 = vmax.f32 %v2009_v13, %v2010_v46  ;;  %v3233_v35 = vmov 0.0  }
 0x362   : > { %v2025_v3 = vmax.f32 %v2023_v16, %v2024_v58  ;;  %v2019_v29 = vrot.slane %v2018_v4, 1  ;;  %2849 = vmatprep.subr.bf16.mxu0 %v3233_v35  ;;  %2857 = vmatprep.subr.bf16.mxu1 %v3233_v35  ;;  %v505_v8 = vadd.s32 8, %v3365_v1  ;;  %vm3234_vm7 = vmmov 0  }
 0x363   : > { %v2006_v28 = vmax.f32 %v2004_v20, %v2005_v0  ;;  %v2012_v30 = vrot.slane %v2011_v27, 1  ;;  %2850 = vmatpush3.bf16.msra.mxu0 %v3143_v26  ;;  %2853 = vmatprep.mubr.msk.bf16.mxu0 %vm3234_vm7, %v3233_v35  ;;  %v2117_v40 = vrot.slane %v2113_v59, 7  ;;  %v2123_v42 = vrot.slane %v2113_v59, 1 }
 0x364   : > { %v2026_v14 = vrot.slane %v2025_v3, 1  ;;  %2851 = vmatprep.subr.bf16.mxu0 %v3233_v35  ;;  %v2020_v47 = vmax.f32 %v2018_v4, %v2019_v29  ;;  %2863 = vmatprep.mubr.msk.bf16.mxu1 %vm3234_vm7, %v3233_v35  ;;  %v2176_v41 = vsel %vm979_vm9, %v3144_v37, 0  ;;  %vm2127_vm8 = vcmp.ge.s32.totalorder %v505_v8, 15 }
 0x365   : > { %v2103_v36 = vsel %vm4252_vm5, %v2006_v28, %v2102_v52  ;;  %v2013_v56 = vmax.f32 %v2011_v27, %v2012_v30  ;;  %2858 = vmatpush3.bf16.msra.mxu1 %v3145_v62  ;;  %vm4254_vm9 = vcmask 1043459  }
 0x366   : > { %v2027_v24 = vmax.f32 %v2025_v3, %v2026_v14  ;;  %2859 = vmatprep.subr.bf16.mxu1 %v3233_v35 }
 0x367   : > { %v2104_v38 = vsel %vm1499_vm14, %v2013_v56, %v2103_v36  ;;  %2852 = vmatpush3.bf16.msra.mxu0 %v2176_v41 }
 0x368   : > { %v2105_v34 = vsel %vm1501_vm15, %v2020_v47, %v2104_v38  ;;  %2867 = vmatprep.subr.bf16.mxu0 %v3233_v35 }
 0x369   : > { %v2106_v44 = vsel %vm1503_vm6, %v2027_v24, %v2105_v34  ;;  %2860 = vmatpush3.bf16.msra.mxu1 %v3146_v63 }
 0x36a   : > { %v3129_v45 = vpack.i.bf16 %v2113_v59, %v2106_v44  ;;  %v2116_v49 = vrot.slane %v2106_v44, 7  ;;  %v2122_v50 = vrot.slane %v2106_v44, 1  ;;  %2861 = vmatprep.subr.bf16.mxu1 %v3233_v35 }
 0x36c   : > { %3130 = vrot.lane.b32.xlu0 %v3129_v45, %s4253_s23  ;;  %v2124_v2 = vsel %vm616_vm2, %v2122_v50, %v2123_v42  ;;  %v2125_v19 = vsel %vm616_vm2, %v2123_v42, %v2122_v50  ;;  %v2118_v51 = vsel %vm584_vm0, %v2116_v49, %v2117_v40  ;;  %v2119_v7 = vsel %vm584_vm0, %v2117_v40, %v2116_v49 }
 0x36d   : > { %v2133_v9 = vsel %vm2127_vm8, 0.0, %v2125_v19  ;;  %v2120_v31 = vsel %vm584_vm0, 0.0, %v2119_v7  ;;  %vm2265_vm2 = vcmask 123904  }
 0x36e   : > { %v3134_v53 = vpack.i.bf16 %v2133_v9, %v2124_v2 }
 0x370   : > { %3135 = vrot.lane.b32.xlu1 %v3134_v53, %s4236_s16  ;;  %s3161_s16 = scalar_lea.vmem %s3160_s3, 32 }
 0x3de   : > { %v3131_v57 = vpop.permute.xlu0 %3130 }
 0x3df   : > { %v3133_v11 = vunpack.i.h.bf16 %v3131_v57  ;;  %v3132_v21 = vunpack.i.l.bf16 %v3131_v57 }
 0x3e1   : > { %v2148_v6 = vsel %vm1754_vm1, %v2120_v31, %v3132_v21  ;;  %v2149_v10 = vsel %vm1754_vm1, %v2118_v51, %v3133_v11  ;;  %vm4255_vm1 = vmmov %vm4252_vm5 }
 0x3e2   : > { %v3136_v32 = vpop.permute.xlu1 %3135 }
 0x3e3   : > { %v3138_v43 = vunpack.i.h.bf16 %v3136_v32  ;;  %v3137_v60 = vunpack.i.l.bf16 %v3136_v32 }
 0x3e5   : > { %v2150_v48 = vsel %vm1759_vm3, %v2148_v6, %v3137_v60  ;;  %v2151_v61 = vsel %vm1759_vm3, %v2149_v10, %v3138_v43 }
 0x3e6   : > { %v2152_v23 = vpack.c.bf16 %v2151_v61, %v2150_v48 }
 0x3e8   : > { %2854 = vmatmul.mubr.msk.bf16.vlgmr.msra.gmra.mrb[0].mxu0 %vm1764_vm4, %v2152_v23 }
 0x3e9   : > { %2875 = vmatprep.mubr.msk.bf16.mxu0 %vm3234_vm7, %v3233_v35 }
 0x4bb   : > { %v2212_v18 = vpop.f32.mrb[0].mxu0 }
 0x4bc   : > { %v2213_v33 = vadd.f32 %v2777_v5, %v2212_v18  ;;  %v2855_v12 = vpop.f32.mrb[1].mxu0 }
 0x4bd   : > { %v2215_v13 = vpop.f32.mrb[2].mxu0 }
 0x4be   : > { %v2219_v15 = vmax.f32 %v2213_v33, 0.0  ;;  %v2216_v16 = vadd.f32 %v2777_v5, %v2215_v13  ;;  %v2856_v17 = vpop.f32.mrb[3].mxu0 }
 0x4c0   : > { %v2223_v39 = vcombine.high %v2219_v15, %v2219_v15  ;;  %v2230_v20 = vrot.slane %v2219_v15, %v3718_v54  ;;  %v2220_v22 = vmax.f32 %v2216_v16, 0.0  ;;  %v3147_v16 = vld [vmem:[%s4219_s7 + $0x10] sm:$0xff]  }
 0x4c1   : > { %2862 = vmatpush3.bf16.msra.mxu1 %v3147_v16 }
 0x4c2   : > { %v2237_v25 = vrot.slane %v2223_v39, %v3718_v54  ;;  %v2238_v46 = vcombine.high %v2230_v20, %v2230_v20  ;;  %v2266_v4 = vsel %vm2265_vm2, %v2230_v20, -inf  ;;  %v2240_v58 = vcombine.high %v2220_v22, %v2220_v22  ;;  %2879 = vmatprep.subr.bf16.mxu1 %v3233_v35 }
 0x4c3   : > { %v2267_v55 = vrot.slane %v2266_v4, 4  ;;  %v2247_v0 = vrot.slane %v2220_v22, %v3718_v54 }
 0x4c4   : > { %v2239_v59 = vcombine.high %v2237_v25, %v2237_v25  ;;  %v2273_v27 = vsel %vm2265_vm2, %v2238_v46, -inf  ;;  %v2280_v3 = vsel %vm2265_vm2, %v2237_v25, -inf  ;;  %v2254_v52 = vrot.slane %v2240_v58, %v3718_v54 }
 0x4c5   : > { %v2268_v26 = vmax.f32 %v2266_v4, %v2267_v55  ;;  %v2274_v28 = vrot.slane %v2273_v27, 4  ;;  %v2281_v29 = vrot.slane %v2280_v3, 4  ;;  %v2255_v30 = vcombine.high %v2247_v0, %v2247_v0 }
 0x4c6   : > { %v2287_v14 = vsel %vm2265_vm2, %v2239_v59, -inf  ;;  %v2256_v36 = vcombine.high %v2254_v52, %v2254_v52  ;;  %v2294_v56 = vsel %vm2265_vm2, %v2247_v0, -inf  ;;  %v2308_v47 = vsel %vm2265_vm2, %v2254_v52, -inf }
 0x4c7   : > { %v2269_v8 = vrot.slane %v2268_v26, 2  ;;  %v2275_v37 = vmax.f32 %v2273_v27, %v2274_v28  ;;  %v2282_v24 = vmax.f32 %v2280_v3, %v2281_v29  ;;  %v2288_v38 = vrot.slane %v2287_v14, 4 }
 0x4c8   : > { %v2295_v34 = vrot.slane %v2294_v56, 4  ;;  %v2301_v40 = vsel %vm2265_vm2, %v2255_v30, -inf  ;;  %v2309_v42 = vrot.slane %v2308_v47, 4  ;;  %v2315_v41 = vsel %vm2265_vm2, %v2256_v36, -inf }
 0x4c9   : > { %v2270_v44 = vmax.f32 %v2268_v26, %v2269_v8  ;;  %v2276_v45 = vrot.slane %v2275_v37, 2  ;;  %v2283_v49 = vrot.slane %v2282_v24, 2  ;;  %v2289_v50 = vmax.f32 %v2287_v14, %v2288_v38  ;;  %v2781_v38 = vld [vmem:[%s4220_s8] ss:$0 sm:$0xff] }
 0x4ca   : > { %v2296_v2 = vmax.f32 %v2294_v56, %v2295_v34  ;;  %v2302_v19 = vrot.slane %v2301_v40, 4  ;;  %v2310_v51 = vmax.f32 %v2308_v47, %v2309_v42  ;;  %v2316_v7 = vrot.slane %v2315_v41, 4 }
 0x4cb   : > { %v2271_v9 = vrot.slane %v2270_v44, 1  ;;  %v2277_v53 = vmax.f32 %v2275_v37, %v2276_v45  ;;  %v2284_v57 = vmax.f32 %v2282_v24, %v2283_v49  ;;  %v2290_v11 = vrot.slane %v2289_v50, 2  ;;  %v3148_v24 = vld [vmem:[%s4221_s9] sm:$0xff]  }
 0x4cc   : > { %v2297_v21 = vrot.slane %v2296_v2, 2  ;;  %v2303_v32 = vmax.f32 %v2301_v40, %v2302_v19  ;;  %v2311_v31 = vrot.slane %v2310_v51, 2  ;;  %v2317_v43 = vmax.f32 %v2315_v41, %v2316_v7  ;;  %2868 = vmatpush3.bf16.msra.mxu0 %v3148_v24 }
 0x4cd   : > { %v2278_v60 = vrot.slane %v2277_v53, 1  ;;  %v2285_v6 = vrot.slane %v2284_v57, 1  ;;  %v2291_v10 = vmax.f32 %v2289_v50, %v2290_v11  ;;  %v2272_v63 = vmax.f32 %v2270_v44, %v2271_v9  ;;  %2869 = vmatprep.subr.bf16.mxu0 %v3233_v35  ;;  %v3150_v11 = vld [vmem:[%s4221_s9 + $0x10] sm:$0xff]  }
 0x4ce   : > { %v2298_v48 = vmax.f32 %v2296_v2, %v2297_v21  ;;  %v2304_v61 = vrot.slane %v2303_v32, 2  ;;  %v2312_v23 = vmax.f32 %v2310_v51, %v2311_v31  ;;  %v2318_v62 = vrot.slane %v2317_v43, 2 }
 0x4cf   : > { %v2279_v5 = vmax.f32 %v2277_v53, %v2278_v60  ;;  %v2286_v18 = vmax.f32 %v2284_v57, %v2285_v6  ;;  %v2292_v33 = vrot.slane %v2291_v10, 1 }
 0x4d0   : > { %v2299_v12 = vrot.slane %v2298_v48, 1  ;;  %v2305_v13 = vmax.f32 %v2303_v32, %v2304_v61  ;;  %v2319_v15 = vmax.f32 %v2317_v43, %v2318_v62  ;;  %v2313_v20 = vrot.slane %v2312_v23, 1  ;;  %v3152_v62 = vld [vmem:[%s4223_s11] sm:$0xff]  }
 0x4d1   : > { %v2293_v17 = vmax.f32 %v2291_v10, %v2292_v33  ;;  %v2330_v39 = vsel %vm1491_vm10, %v2279_v5, %v2272_v63  ;;  %vm2341_vm10 = vcmp.ge.s32.totalorder %v3365_v1, 7  ;;  %v3149_v1 = vld [vmem:[%s4221_s9 + $0x8] sm:$0xff]   ;;  %v3151_v10 = vld [vmem:[%s4221_s9 + $0x18] sm:$0xff]  }
 0x4d2   : > { %v2306_v22 = vrot.slane %v2305_v13, 1  ;;  %v2320_v25 = vrot.slane %v2319_v15, 1  ;;  %v2300_v46 = vmax.f32 %v2298_v48, %v2299_v12  ;;  %v2331_v4 = vsel %vm1493_vm11, %v2286_v18, %v2330_v39  ;;  %2870 = vmatpush3.bf16.msra.mxu0 %v3149_v1 }
 0x4d3   : > { %v2332_v55 = vsel %vm4254_vm9, %v2293_v17, %v2331_v4  ;;  %v2314_v0 = vmax.f32 %v2312_v23, %v2313_v20  ;;  %2871 = vmatprep.subr.bf16.mxu0 %v3233_v35  ;;  %vm2689_vm11 = vcmask 8192  }
 0x4d4   : > { %v2307_v58 = vmax.f32 %v2305_v13, %v2306_v22  ;;  %v2333_v59 = vsel %vm4255_vm1, %v2300_v46, %v2332_v55  ;;  %v2321_v27 = vmax.f32 %v2319_v15, %v2320_v25 }
 0x4d6   : > { %v2334_v3 = vsel %vm1499_vm14, %v2307_v58, %v2333_v59  ;;  %2872 = vmatpush3.bf16.msra.mxu0 %v3150_v11 }
 0x4d7   : > { %v2335_v52 = vsel %vm1501_vm15, %v2314_v0, %v2334_v3  ;;  %2873 = vmatprep.subr.bf16.mxu0 %v3233_v35 }
 0x4d8   : > { %v2336_v26 = vsel %vm1503_vm6, %v2321_v27, %v2335_v52  ;;  %v3153_v52 = vld [vmem:[%s4223_s11 + $0x8] sm:$0xff]  }
 0x4d9   : > { %2345 = vrot.lane.b32.xlu0 %v2336_v26, %s4256_s26  ;;  %v2340_v28 = vrot.slane %v2336_v26, 1  ;;  %v2338_v30 = vrot.slane %v2336_v26, 7  ;;  %v3154_v26 = vld [vmem:[%s4225_s13] sm:$0xff]  }
 0x4da   : > { %2874 = vmatpush3.bf16.msra.mxu0 %v3151_v10 }
 0x4db   : > { %v2344_v29 = vsel %vm2341_vm10, 0.0, %v2340_v28  ;;  %v2339_v36 = vsel %vm584_vm0, 0.0, %v2338_v30  ;;  %2887 = vmatprep.subr.bf16.mxu0 %v3233_v35  ;;  %vm2529_vm0 = vcmask 523264   ;;  %v2504_v28 = vld [vmem:[%s4222_s10] sm:$0x1] }
 0x4dc   : > { %2349 = vrot.lane.b32.xlu1 %v2344_v29, %s4257_s30 }
 0x54b   : > { %v2346_v14 = vpop.permute.xlu0 %2345 }
 0x54c   : > { %v2352_v56 = vsel %vm1759_vm3, %v2339_v36, %v2346_v14 }
 0x54e   : > { %v2350_v47 = vpop.permute.xlu1 %2349 }
 0x54f   : > { %v2353_v8 = vsel %vm1769_vm12, %v2352_v56, %v2350_v47 }
 0x550   : > { %v2354_v37 = vpack.c.bf16 %v2353_v8, %v2353_v8  ;;  %v2579_v8 = vld [vmem:[%s4224_s12] sm:$0x1] }
 0x552   : > { %2864 = vmatmul.mubr.msk.bf16.vlgmr.msra.gmra.mrb[12].mxu1 %vm1779_vm13, %v2354_v37 }
 0x553   : > { %2883 = vmatprep.mubr.msk.bf16.mxu1 %vm3234_vm7, %v3233_v35  ;;  %2880 = vmatpush3.bf16.msra.mxu1 %v3152_v62 }
 0x554   : > { %2881 = vmatprep.subr.bf16.mxu1 %v3233_v35 }
 0x557   : > { %2882 = vmatpush3.bf16.msra.mxu1 %v3153_v52 }
 0x625   : > { %v2423_v34 = vpop.f32.mrb[12].mxu1 }
 0x626   : > { %v2424_v40 = vadd.f32 %v2781_v38, %v2423_v34  ;;  %v2865_v42 = vpop.f32.mrb[13].mxu1 }
 0x627   : > { %v2426_v41 = vpop.f32.mrb[14].mxu1 }
 0x628   : > { %v2429_v44 = vmax.f32 %v2424_v40, 0.0  ;;  %v2866_v45 = vpop.f32.mrb[15].mxu1  ;;  %v2639_v41 = vld [vmem:[%s4226_s14] sm:$0x1] }
 0x62a   : > { %v2431_v49 = vcombine.high %v2429_v44, %v2429_v44  ;;  %v2438_v50 = vrot.slane %v2429_v44, %v3718_v54 }
 0x62c   : > { %v2445_v2 = vrot.slane %v2431_v49, %v3718_v54  ;;  %v2446_v19 = vcombine.high %v2438_v50, %v2438_v50  ;;  %v2452_v16 = vsel %vm2265_vm2, %v2438_v50, -inf }
 0x62d   : > { %v2453_v17 = vrot.slane %v2452_v16, 4 }
 0x62e   : > { %v2447_v51 = vcombine.high %v2445_v2, %v2445_v2  ;;  %v2459_v7 = vsel %vm2265_vm2, %v2446_v19, -inf  ;;  %v2466_v9 = vsel %vm2265_vm2, %v2445_v2, -inf }
 0x62f   : > { %v2460_v53 = vrot.slane %v2459_v7, 4  ;;  %v2467_v57 = vrot.slane %v2466_v9, 4  ;;  %v2454_v39 = vmax.f32 %v2452_v16, %v2453_v17 }
 0x630   : > { %v2473_v21 = vsel %vm2265_vm2, %v2447_v51, -inf }
 0x631   : > { %v2461_v32 = vmax.f32 %v2459_v7, %v2460_v53  ;;  %v2468_v31 = vmax.f32 %v2466_v9, %v2467_v57  ;;  %v2474_v43 = vrot.slane %v2473_v21, 4  ;;  %v2455_v20 = vrot.slane %v2454_v39, 2 }
 0x633   : > { %v2462_v54 = vrot.slane %v2461_v32, 2  ;;  %v2469_v60 = vrot.slane %v2468_v31, 2  ;;  %v2475_v6 = vmax.f32 %v2473_v21, %v2474_v43  ;;  %v2456_v22 = vmax.f32 %v2454_v39, %v2455_v20 }
 0x635   : > { %v2463_v48 = vmax.f32 %v2461_v32, %v2462_v54  ;;  %v2470_v61 = vmax.f32 %v2468_v31, %v2469_v60  ;;  %v2476_v23 = vrot.slane %v2475_v6, 2  ;;  %v2457_v25 = vrot.slane %v2456_v22, 1 }
 0x637   : > { %v2464_v63 = vrot.slane %v2463_v48, 1  ;;  %v2471_v5 = vrot.slane %v2470_v61, 1  ;;  %v2477_v18 = vmax.f32 %v2475_v6, %v2476_v23  ;;  %v2458_v46 = vmax.f32 %v2456_v22, %v2457_v25 }
 0x639   : > { %v2465_v33 = vmax.f32 %v2463_v48, %v2464_v63  ;;  %v2472_v12 = vmax.f32 %v2470_v61, %v2471_v5  ;;  %v2478_v13 = vrot.slane %v2477_v18, 1 }
 0x63b   : > { %2481 = vrot.lane.b32.xlu0 %v2465_v33, %s4256_s26  ;;  %2485 = vrot.lane.b32.xlu1 %v2472_v12, %s4257_s30  ;;  %v2479_v15 = vmax.f32 %v2477_v18, %v2478_v13  ;;  %s486_s26 = sand.u32 1, %s3209_s19  }
 0x63c   : > { %s487_s23 = scalar_lea.vmem [#allocation2], %s486_s26  ;;  %s2692_s22 = scalar_lea.sflag [#allocation3], %s486_s26 }
 0x63d   : > { %s2704_s25 = sshll.u32 %s487_s23, 4  ;;  %s4172_s25 = int_to_ptr.vmem [resolvable:$true] %s2704_s25 }
 0x63e   : > { %s3155_s30 = scalar_lea.vmem %s4172_s25, 16  ;;  %p3162_p0 = scmp.lt.s32.totalorder %s4172_s25, %s3160_s3 }
 0x63f   : > { %2489 = vrot.lane.b32.xlu0 %v2479_v15, %s4258_s0  ;;  %p3156_p11 = scmp.ne.s32.totalorder %s4172_s25, %s3155_s30  ;;  %p3163_p1 = scmp.lt.s32.totalorder %s3161_s16, %s3155_s30 }
 0x641   : > { %p3157_p12 = pnand %p3156_p11, %p3354_p5  ;;  %p3164_p2 = por %p3163_p1, %p3162_p0 }
 0x643   : > { %p3158_p13 = pneg %p3157_p12 }
 0x645   : > { %p3165_p3 = pnand %p3164_p2, %p3158_p13 }
 0x6ad   : > { %v2482_v4 = vpop.permute.xlu0 %2481  ;;  %v2486_v55 = vpop.permute.xlu1 %2485 }
 0x6ae   : > { %v2492_v58 = vsel %vm1759_vm3, %v2458_v46, %v2482_v4 }
 0x6af   : > { %v2493_v0 = vsel %vm1769_vm12, %v2492_v58, %v2486_v55 }
 0x6b1   : > { %v2490_v59 = vpop.permute.xlu0 %2489 }
 0x6b2   : > { %v2494_v27 = vsel %vm1779_vm13, %v2493_v0, %v2490_v59 }
 0x6b3   : > { %v2495_v3 = vpack.c.bf16 %v2494_v27, %v2494_v27 }
 0x6b5   : > { %2876 = vmatmul.mubr.msk.bf16.vlgmr.msra.gmra.mrb[4].mxu0 %vm2529_vm0, %v2495_v3 }
 0x6b6   : > { %2889 = vmatprep.mubr.msk.bf16.mxu0 %vm3234_vm7, %v3233_v35  ;;  %2888 = vmatpush3.bf16.msra.mxu0 %v3154_v26 }
 0x788   : > { %v2567_v29 = vpop.f32.mrb[4].mxu0 }
 0x789   : > { %v2568_v30 = vadd.f32 %v2567_v29, %v2504_v28  ;;  %v2877_v14 = vpop.f32.mrb[5].mxu0 }
 0x78a   : > { %v2570_v36 = vpop.f32.mrb[6].mxu0 }
 0x78b   : > { %v2573_v35 = vmax.f32 %v2568_v30, 0.0  ;;  %v2878_v56 = vpop.f32.mrb[7].mxu0 }
 0x78d   : > { %v2574_v47 = vpack.c.bf16 %v2573_v35, %v2573_v35 }
 0x78f   : > { %2884 = vmatmul.mubr.msk.bf16.vlgmr.msra.gmra.mrb[16].mxu1 %vm1769_vm12, %v2574_v47 }
 0x862   : > { %v2629_v37 = vpop.f32.mrb[16].mxu1 }
 0x863   : > { %v2630_v24 = vadd.f32 %v2629_v37, %v2579_v8  ;;  %v2885_v1 = vpop.f32.mrb[17].mxu1 }
 0x864   : > { %v2632_v38 = vpop.f32.mrb[18].mxu1 }
 0x865   : > { %v2635_v34 = vmax.f32 %v2630_v24, 0.0  ;;  %v2886_v40 = vpop.f32.mrb[19].mxu1 }
 0x867   : > { %v2636_v42 = vpack.c.bf16 %v2635_v34, %v2635_v34 }
 0x869   : > { %2890 = vmatmul.mubr.msk.bf16.vlgmr.msra.gmra.mrb[8].mxu0 %vm1759_vm3, %v2636_v42 }
 0x93c   : > { %v2683_v44 = vpop.f32.mrb[8].mxu0 }
 0x93d   : > { %v2684_v45 = vadd.f32 %v2683_v44, %v2639_v41  ;;  %v2891_v49 = vpop.f32.mrb[9].mxu0 }
 0x93e   : > { %v2686_v50 = vpop.f32.mrb[10].mxu0 }
 0x93f   : > { %v2892_v2 = vpop.f32.mrb[11].mxu0  ;;  %2690 = vst.msk [vmem:[%s487_s23] sm:$0x1] %vm2689_vm11, %v2684_v45 }
 0x940   : > { %3168 = shalt.err (!%p3165_p3)
}
 0x941   : > { %s3169_s26 = scalar_lea.hbm %s4170_s2, 16  ;;  %s3173_s0 = scalar_lea.hbm %s4227_s15, 32 }
 0x942   : > { %p3170_p4 = scmp.ne.s32.totalorder %s4170_s2, %s3169_s26  ;;  %p3174_p9 = scmp.lt.u32.totalorder %s4170_s2, %s4227_s15 }
 0x943   : > { %p3175_p10 = scmp.lt.u32.totalorder %s3173_s0, %s3169_s26  ;;  %p3177_p12 = scmp.lt.u32.totalorder %s3169_s26, %s4170_s2 }
 0x944   : > { %p3171_p7 = pnand %p3170_p4, %p3354_p5 }
 0x945   : > { %p3176_p11 = por %p3175_p10, %p3174_p9 }
 0x946   : > { %p3172_p8 = pneg %p3171_p7 }
 0x947   : > { %p3178_p13 = por %p3177_p12, %p3176_p11 }
 0x949   : > { %p3179_p0 = pnand %p3178_p13, %p3172_p8 }
 0x94b   : > { %3182 = shalt.err (!%p3179_p0)
}
 0x94c   : > { %2894 = dma.vmem_to_hbm [thread:$0]  (%p3354_p5), %s4172_s25, 16, %s4170_s2, %s2692_s22  }
 0x94d PF: > { %p2900_p1 = scmp.ge.s32.totalorder %s3217_s21, 2  ;;  %s2716_s30 = sand.u32 1, %s3205_s18  }
 0x94e   : > { %s2717_s16 = scalar_lea.sflag [#allocation3], %s2716_s30 }
 0x94f   : > { %p2897_p2 = pnand %p2900_p1, %p3358_p6 }
 0x951   : > { %3200 = dma.done.wait (!%p2897_p2), %s2717_s16, 16  }
 0x952   : > { %3202 = vsyncadd (!%p2897_p2), %s2717_s16, 4294967280  ;;  %p25_p3 = scmp.ge.s32.totalorder %s3341_s24, 4   ;;  %s4259_s18 = smov %s3209_s19 }
 0x953   : > { %s4260_s19 = smov %s3213_s20  ;;  %s4261_s20 = smov %s3352_s27 }
 0x954   : > { %s4262_s21 = smov %s3341_s24  ;;  %27 = sbr.rel (!%p25_p3) target bundleno = 8 (0x8), region = 115 }
 0x95b   :  { %2721 = vsyncpa [#allocation3], 1 }
 0x95c   :  { %2723 = vsyncpa [#allocation3 + $0x1], 1 }

</bundles_post_ra>
